<compile_context>
chip_gen: v6e
topology: v6e:2x2x1
jax: 0.10.0
libtpu: 0.0.40
codegen_flags: <defaults>
</compile_context>

<pallas_src>
import math

import jax
import jax.numpy as jnp
from jax.experimental import pallas as pl
from jax.experimental.pallas import tpu as pltpu


# ---------------------------------------------------------------------------
# Kernel: one (1, tp, K) tile of patches -> one (1, tp, D) tile of embeddings.
#   out = (x @ W + bias + pos) * (1 - m) + mask_token * m
# ---------------------------------------------------------------------------
def _beit_embed_kernel(x_ref, w_ref, b_ref, pos_ref, mt_ref, m_ref, o_ref):
    x = x_ref[0]                                                     # (tp, K) bf16/f32
    acc = jnp.dot(x, w_ref[...], preferred_element_type=jnp.float32)  # MXU, f32 acc
    acc = acc + b_ref[...].astype(jnp.float32)                       # (1, D) broadcast
    acc = acc + pos_ref[0].astype(jnp.float32)                       # (tp, D)
    m = m_ref[0].astype(jnp.float32)                                 # (tp, 1)
    acc = acc * (1.0 - m) + mt_ref[...].astype(jnp.float32) * m      # mask blend (VPU)
    o_ref[0] = acc.astype(o_ref.dtype)


# ---------------------------------------------------------------------------
# Tiling helpers
# ---------------------------------------------------------------------------
def _vmem_capacity_bytes():
    """Per-core VMEM; fall back to the smallest generation (v7x: 64 MiB)."""
    try:
        return int(getattr(pltpu.get_tpu_info(), "vmem_capacity_bytes", 64 * 2 ** 20))
    except Exception:
        return 64 * 2 ** 20


def _choose_row_tile(P, K, D, x_bytes, o_bytes, cap=512):
    """Largest sublane-aligned row tile that keeps the double-buffered,
    row-tiled working set well under VMEM while leaving a multi-step grid."""
    vmem = _vmem_capacity_bytes()
    per_row = 2 * (K * x_bytes + D * 4 + 4 + D * o_bytes)   # x, pos, mask, out (x2 buf)
    budget_rows = max(8, (vmem // 4) // max(per_row, 1))
    tp = min(P, cap, budget_rows)
    if tp >= P:
        return P                        # full-extent block is always legal
    return max(8, (tp // 8) * 8)        # sublane-aligned


# ---------------------------------------------------------------------------
# Forward wrapper
# ---------------------------------------------------------------------------
def beit_embeddings_forward(image, patch_size, weight, bias, cls_token,
                            mask_token, position_embeddings, bool_masked_pos,
                            *, matmul_dtype=jnp.bfloat16, row_tile=None,
                            single_buffer_consts=True):
    """image: (B, H, W); weight: (p1*p2, D) laid out [in, out] (PyTorch Linear
    stores [out, in]); bias: (D,); cls_token/mask_token: (1, 1, D);
    position_embeddings: (1, P+1, D); bool_masked_pos: (1, P) in {0, 1}
    (the torch.randint mask, passed explicitly so the function stays pure)."""
    B, H, W = image.shape
    p1, p2 = patch_size
    h, w = H // p1, W // p2
    P, K = h * w, p1 * p2
    D = weight.shape[1]
    out_dtype = image.dtype

    # -- 1. patchify: 'b (h p1) (w p2) -> b (h w) (p1 p2)'  (layout only -> XLA)
    x = jnp.transpose(image.reshape(B, h, p1, w, p2), (0, 1, 3, 2, 4)).reshape(B, P, K)

    # -- 3. position-embedding shuffle (view / permute / interpolate / flatten).
    pos_patch = position_embeddings[:, 1:, :]                        # (1, P, D)
    C = (P * D) // K
    pos_grid = jnp.transpose(pos_patch.reshape(1, p1, p2, C), (0, 3, 1, 2))
    # F.interpolate(..., size=(p1, p2), mode='bicubic') resamples onto the SAME
    # grid here, i.e. it is the identity map.
    # TODO(synk): general bicubic resize (target grid != source grid) not implemented.
    pos_add = jnp.broadcast_to(pos_grid.reshape(1, C, K), (1, P, D)).astype(jnp.float32)

    # -- kernel operands (bf16 MXU inputs by default; epilogue operands stay f32)
    if matmul_dtype is not None:
        x_k, w_k = x.astype(matmul_dtype), weight.astype(matmul_dtype)
    else:
        x_k, w_k = x, weight
    b_k = bias.reshape(1, D).astype(jnp.float32)
    mt_k = mask_token.reshape(1, D).astype(jnp.float32)
    m_k = bool_masked_pos.reshape(1, P, 1).astype(jnp.float32)

    x_bytes = x_k.dtype.itemsize
    w_bytes = w_k.dtype.itemsize
    o_bytes = jnp.dtype(out_dtype).itemsize

    if row_tile is None:
        tp = _choose_row_tile(P, K, D, x_bytes, o_bytes)
    else:
        tp = min(int(row_tile), P)
        if tp < P:
            tp = max(8, (tp // 8) * 8)
    grid = (B, pl.cdiv(P, tp))

    # VMEM budget: double-buffered row tiles + grid-invariant constants.
    per_step = tp * (K * x_bytes + D * 4 + 4 + D * o_bytes)
    const = K * D * w_bytes + 2 * D * 4
    vmem_limit = int(min(max(4 * (2 * per_step + 2 * const), 16 * 2 ** 20), 64 * 2 ** 20))

    cost = pl.CostEstimate(
        flops=2 * B * P * K * D,
        transcendentals=0,
        bytes_accessed=int(x_k.size * x_bytes + w_k.size * w_bytes
                           + (b_k.size + mt_k.size + m_k.size) * 4
                           + pos_add.size * 4 + B * P * D * o_bytes),
    )

    def build(single_buffer):
        const_kwargs = dict(pipeline_mode=pl.Buffered(1)) if single_buffer else {}
        in_specs = [
            pl.BlockSpec((1, tp, K), lambda b, j: (b, j, 0)),            # patches
            pl.BlockSpec((K, D), lambda b, j: (0, 0), **const_kwargs),   # weight
            pl.BlockSpec((1, D), lambda b, j: (0, 0), **const_kwargs),   # bias
            pl.BlockSpec((1, tp, D), lambda b, j: (0, j, 0)),            # pos embed
            pl.BlockSpec((1, D), lambda b, j: (0, 0), **const_kwargs),   # mask token
            pl.BlockSpec((1, tp, 1), lambda b, j: (0, j, 0)),            # bool mask
        ]
        out_specs = pl.BlockSpec((1, tp, D), lambda b, j: (b, j, 0))
        return pl.pallas_call(
            _beit_embed_kernel,
            out_shape=jax.ShapeDtypeStruct((B, P, D), out_dtype),
            grid_spec=pltpu.PrefetchScalarGridSpec(
                num_scalar_prefetch=0, grid=grid,
                in_specs=in_specs, out_specs=out_specs),
            compiler_params=pltpu.CompilerParams(
                dimension_semantics=("parallel", "parallel"),
                vmem_limit_bytes=vmem_limit),
            cost_estimate=cost,
        )

    args = (x_k, w_k, b_k, pos_add, mt_k, m_k)
    if single_buffer_consts:
        try:
            patch_emb = build(True)(*args)
        except Exception:
            # TODO(synk): this JAX build rejected pl.Buffered(1) on grid-invariant
            # operands; fall back to default double buffering (correctness identical).
            patch_emb = build(False)(*args)
    else:
        patch_emb = build(False)(*args)

    # -- 5. prepend cls_token + position_embeddings[:, :1, :]   (layout only -> XLA)
    cls = (cls_token + position_embeddings[:, :1, :]).astype(out_dtype)
    cls = jnp.broadcast_to(cls, (B, 1, D))
    out = jnp.concatenate([cls, patch_emb], axis=1)

    # -- 6. dropout: eval-mode identity.
    # TODO(synk): training-mode dropout (random keep mask + 1/(1-p) scaling) not implemented.
    return out


# ---------------------------------------------------------------------------
# Pure-JAX reference (mirrors the PyTorch forward exactly)
# ---------------------------------------------------------------------------
def beit_embeddings_reference(image, patch_size, weight, bias, cls_token,
                              mask_token, position_embeddings, bool_masked_pos,
                              matmul_dtype=None):
    B, H, W = image.shape
    p1, p2 = patch_size
    h, w = H // p1, W // p2
    P, K = h * w, p1 * p2
    D = weight.shape[1]
    x = jnp.transpose(image.reshape(B, h, p1, w, p2), (0, 1, 3, 2, 4)).reshape(B, P, K)
    if matmul_dtype is not None:
        emb = jnp.dot(x.astype(matmul_dtype), weight.astype(matmul_dtype),
                      preferred_element_type=jnp.float32) + bias
    else:
        emb = x @ weight + bias
    pos_patch = position_embeddings[:, 1:, :]
    C = (P * D) // K
    pos = jnp.transpose(pos_patch.reshape(1, p1, p2, C), (0, 3, 1, 2)).reshape(1, C, K)
    emb = emb + pos                                   # bicubic-to-same-size == identity
    m = bool_masked_pos.astype(emb.dtype)[..., None]
    emb = emb * (1 - m) + mask_token * m
    cls = jnp.broadcast_to(cls_token + position_embeddings[:, :1, :], (B, 1, D))
    return jnp.concatenate([cls, emb], axis=1).astype(image.dtype)


if __name__ == "__main__":
    B, H, W = 2, 128, 128
    patch_size = (16, 16)
    p1, p2 = patch_size
    K = p1 * p2                       # patch embedding dim = 256
    D = 256                           # embedding_dimension; the module's pos-embed
                                      # reshape/broadcast requires D == p1*p2
    P = (H // p1) * (W // p2)         # 64 patches

    key = jax.random.PRNGKey(0)
    k_img, k_w, k_b, k_cls, k_mt, k_pos, k_m = jax.random.split(key, 7)

    image = jax.random.normal(k_img, (B, H, W), dtype=jnp.float32)
    bound = 1.0 / math.sqrt(K)
    # PyTorch nn.Linear stores weight as (out, in); we keep (in, out) for x @ W.
    weight = jax.random.uniform(k_w, (K, D), jnp.float32, -bound, bound)
    bias = jax.random.uniform(k_b, (D,), jnp.float32, -bound, bound)
    # cls/mask/pos are zero-initialised Parameters in the module; use small random
    # values so the test exercises the full data path.
    cls_token = 0.02 * jax.random.normal(k_cls, (1, 1, D), dtype=jnp.float32)
    mask_token = 0.02 * jax.random.normal(k_mt, (1, 1, D), dtype=jnp.float32)
    position_embeddings = 0.02 * jax.random.normal(k_pos, (1, P + 1, D), dtype=jnp.float32)
    # torch.randint(0, 2, (1, seq_len)) equivalent, passed in explicitly.
    bool_masked_pos = jax.random.randint(k_m, (1, P), 0, 2)

    out = beit_embeddings_forward(
        image, patch_size, weight, bias, cls_token, mask_token,
        position_embeddings, bool_masked_pos,
        matmul_dtype=jnp.bfloat16,     # MXU-native inputs, f32 accumulation
        row_tile=32,                   # grid = (B, P/32) = (2, 2): multi-step, parallel
    )
    out = jax.block_until_ready(out)
    assert out.shape == (B, P + 1, D), out.shape

    # Tight check against a reference that mirrors the kernel's bf16 MXU matmul.
    ref_bf16 = beit_embeddings_reference(
        image, patch_size, weight, bias, cls_token, mask_token,
        position_embeddings, bool_masked_pos, matmul_dtype=jnp.bfloat16)
    assert jnp.allclose(out, ref_bf16, atol=1e-3, rtol=1e-3), "mismatch vs bf16 reference"

    # Semantic check against the full-f32 PyTorch-equivalent math (bf16 tolerance).
    ref_f32 = beit_embeddings_reference(
        image, patch_size, weight, bias, cls_token, mask_token,
        position_embeddings, bool_masked_pos, matmul_dtype=None)
    assert jnp.allclose(out, ref_f32, atol=3e-2, rtol=3e-2), "mismatch vs f32 reference"

    print("KERNEL_OK")
</pallas_src>

<mosaic_0001>
module attributes {stable_mosaic.version = 11 : i64} {
  func.func @_beit_embed_kernel(%arg0: i32, %arg1: i32, %arg2: memref<1x32x256xbf16, #tpu.memory_space<vmem>>, %arg3: memref<256x256xbf16, #tpu.memory_space<vmem>>, %arg4: memref<1x256xf32, #tpu.memory_space<vmem>>, %arg5: memref<1x32x256xf32, #tpu.memory_space<vmem>>, %arg6: memref<1x256xf32, #tpu.memory_space<vmem>>, %arg7: memref<1x32x1xf32, #tpu.memory_space<vmem>>, %arg8: memref<1x32x256xf32, #tpu.memory_space<vmem>>) attributes {dimension_semantics = [#tpu.dimension_semantics<parallel>, #tpu.dimension_semantics<parallel>], iteration_bounds = array<i64: 2, 2>, scalar_prefetch = 0 : i64, scratch_operands = 0 : i64, tpu.core_type = #tpu.core_type<tc>, window_params = [{transform_indices = @transform_0, window_bounds = array<i64: 1, 32, 256>}, {pipeline_mode = #tpu.pipeline_mode<synchronous>, transform_indices = @transform_1, window_bounds = array<i64: 256, 256>}, {pipeline_mode = #tpu.pipeline_mode<synchronous>, transform_indices = @transform_2, window_bounds = array<i64: 1, 256>}, {transform_indices = @transform_3, window_bounds = array<i64: 1, 32, 256>}, {pipeline_mode = #tpu.pipeline_mode<synchronous>, transform_indices = @transform_4, window_bounds = array<i64: 1, 256>}, {transform_indices = @transform_5, window_bounds = array<i64: 1, 32, 1>}, {transform_indices = @transform_6, window_bounds = array<i64: 1, 32, 256>}]} {
    %c0 = arith.constant 0 : index
    %c0_0 = arith.constant 0 : index
    %c0_1 = arith.constant 0 : index
    %0 = vector.load %arg2[%c0, %c0_0, %c0_1] : memref<1x32x256xbf16, #tpu.memory_space<vmem>>, vector<1x32x256xbf16>
    %1 = vector.shape_cast %0 : vector<1x32x256xbf16> to vector<32x256xbf16>
    %c0_2 = arith.constant 0 : index
    %c0_3 = arith.constant 0 : index
    %2 = vector.load %arg3[%c0_2, %c0_3] : memref<256x256xbf16, #tpu.memory_space<vmem>>, vector<256x256xbf16>
    %cst = arith.constant dense<0.000000e+00> : vector<32x256xf32>
    %3 = tpu.matmul %1, %2, %cst {dimension_numbers = #tpu.dot_dimension_numbers<[1], [0], [0], [1], [0, 0, 1, 1], [], []>} : vector<32x256xbf16>, vector<256x256xbf16>, vector<32x256xf32> -> vector<32x256xf32>
    %c0_4 = arith.constant 0 : index
    %c0_5 = arith.constant 0 : index
    %4 = vector.load %arg4[%c0_4, %c0_5] : memref<1x256xf32, #tpu.memory_space<vmem>>, vector<1x256xf32>
    %5 = vector.broadcast %4 : vector<1x256xf32> to vector<32x256xf32>
    %6 = arith.addf %3, %5 : vector<32x256xf32>
    %c0_6 = arith.constant 0 : index
    %c0_7 = arith.constant 0 : index
    %c0_8 = arith.constant 0 : index
    %7 = vector.load %arg5[%c0_6, %c0_7, %c0_8] : memref<1x32x256xf32, #tpu.memory_space<vmem>>, vector<1x32x256xf32>
    %8 = vector.shape_cast %7 : vector<1x32x256xf32> to vector<32x256xf32>
    %9 = arith.addf %6, %8 : vector<32x256xf32>
    %c0_9 = arith.constant 0 : index
    %c0_10 = arith.constant 0 : index
    %c0_11 = arith.constant 0 : index
    %10 = vector.load %arg7[%c0_9, %c0_10, %c0_11] : memref<1x32x1xf32, #tpu.memory_space<vmem>>, vector<1x32x1xf32>
    %11 = vector.shape_cast %10 : vector<1x32x1xf32> to vector<32x1xf32>
    %cst_12 = arith.constant 1.000000e+00 : f32
    %12 = vector.broadcast %cst_12 : f32 to vector<32x1xf32>
    %13 = arith.subf %12, %11 : vector<32x1xf32>
    %14 = vector.broadcast %13 : vector<32x1xf32> to vector<32x256xf32>
    %15 = arith.mulf %9, %14 : vector<32x256xf32>
    %c0_13 = arith.constant 0 : index
    %c0_14 = arith.constant 0 : index
    %16 = vector.load %arg6[%c0_13, %c0_14] : memref<1x256xf32, #tpu.memory_space<vmem>>, vector<1x256xf32>
    %17 = vector.broadcast %16 : vector<1x256xf32> to vector<32x256xf32>
    %18 = vector.broadcast %11 : vector<32x1xf32> to vector<32x256xf32>
    %19 = arith.mulf %17, %18 : vector<32x256xf32>
    %20 = arith.addf %15, %19 : vector<32x256xf32>
    %c0_15 = arith.constant 0 : index
    %c0_16 = arith.constant 0 : index
    %c0_17 = arith.constant 0 : index
    %21 = vector.load %arg8[%c0_15, %c0_16, %c0_17] : memref<1x32x256xf32, #tpu.memory_space<vmem>>, vector<1x32x256xf32>
    %22 = vector.shape_cast %21 : vector<1x32x256xf32> to vector<32x256xf32>
    %23 = vector.shape_cast %20 : vector<32x256xf32> to vector<1x32x256xf32>
    tpu.vector_store %arg8[%c0_15, %c0_16, %c0_17], %23 {strides = array<i32>} : memref<1x32x256xf32, #tpu.memory_space<vmem>>, vector<1x32x256xf32>,
    return
  }
  func.func @transform_0(%arg0: i32, %arg1: i32) -> (i32, i32, i32) {
    %c0_i32 = arith.constant 0 : i32
    %c0_i32_0 = arith.constant 0 : i32
    return %arg0, %arg1, %c0_i32 : i32, i32, i32
  }
  func.func @transform_1(%arg0: i32, %arg1: i32) -> (i32, i32) {
    %c0_i32 = arith.constant 0 : i32
    %c0_i32_0 = arith.constant 0 : i32
    %c0_i32_1 = arith.constant 0 : i32
    return %c0_i32, %c0_i32_0 : i32, i32
  }
  func.func @transform_2(%arg0: i32, %arg1: i32) -> (i32, i32) {
    %c0_i32 = arith.constant 0 : i32
    %c0_i32_0 = arith.constant 0 : i32
    %c0_i32_1 = arith.constant 0 : i32
    return %c0_i32, %c0_i32_0 : i32, i32
  }
  func.func @transform_3(%arg0: i32, %arg1: i32) -> (i32, i32, i32) {
    %c0_i32 = arith.constant 0 : i32
    %c0_i32_0 = arith.constant 0 : i32
    %c0_i32_1 = arith.constant 0 : i32
    return %c0_i32, %arg1, %c0_i32_0 : i32, i32, i32
  }
  func.func @transform_4(%arg0: i32, %arg1: i32) -> (i32, i32) {
    %c0_i32 = arith.constant 0 : i32
    %c0_i32_0 = arith.constant 0 : i32
    %c0_i32_1 = arith.constant 0 : i32
    return %c0_i32, %c0_i32_0 : i32, i32
  }
  func.func @transform_5(%arg0: i32, %arg1: i32) -> (i32, i32, i32) {
    %c0_i32 = arith.constant 0 : i32
    %c0_i32_0 = arith.constant 0 : i32
    %c0_i32_1 = arith.constant 0 : i32
    return %c0_i32, %arg1, %c0_i32_0 : i32, i32, i32
  }
  func.func @transform_6(%arg0: i32, %arg1: i32) -> (i32, i32, i32) {
    %c0_i32 = arith.constant 0 : i32
    %c0_i32_0 = arith.constant 0 : i32
    return %arg0, %arg1, %c0_i32 : i32, i32, i32
  }
}

module attributes {stable_mosaic.version = 11 : i64} {
  func.func @_beit_embed_kernel(%arg0: i32, %arg1: i32, %arg2: memref<1x32x256xbf16, #tpu.memory_space<vmem>>, %arg3: memref<256x256xbf16, #tpu.memory_space<vmem>>, %arg4: memref<1x256xf32, #tpu.memory_space<vmem>>, %arg5: memref<1x32x256xf32, #tpu.memory_space<vmem>>, %arg6: memref<1x256xf32, #tpu.memory_space<vmem>>, %arg7: memref<1x32x1xf32, #tpu.memory_space<vmem>>, %arg8: memref<1x32x256xf32, #tpu.memory_space<vmem>>) attributes {dimension_semantics = [#tpu.dimension_semantics<parallel>, #tpu.dimension_semantics<parallel>], iteration_bounds = array<i64: 2, 2>, scalar_prefetch = 0 : i64, scratch_operands = 0 : i64, tpu.core_type = #tpu.core_type<tc>, window_params = [{transform_indices = @transform_0, window_bounds = array<i64: 1, 32, 256>}, {pipeline_mode = #tpu.pipeline_mode<synchronous>, transform_indices = @transform_1, window_bounds = array<i64: 256, 256>}, {pipeline_mode = #tpu.pipeline_mode<synchronous>, transform_indices = @transform_2, window_bounds = array<i64: 1, 256>}, {transform_indices = @transform_3, window_bounds = array<i64: 1, 32, 256>}, {pipeline_mode = #tpu.pipeline_mode<synchronous>, transform_indices = @transform_4, window_bounds = array<i64: 1, 256>}, {transform_indices = @transform_5, window_bounds = array<i64: 1, 32, 1>}, {transform_indices = @transform_6, window_bounds = array<i64: 1, 32, 256>}]} {
    %c0 = arith.constant 0 : index
    %c0_0 = arith.constant 0 : index
    %c0_1 = arith.constant 0 : index
    %0 = vector.load %arg2[%c0, %c0_0, %c0_1] : memref<1x32x256xbf16, #tpu.memory_space<vmem>>, vector<1x32x256xbf16>
    %1 = vector.shape_cast %0 : vector<1x32x256xbf16> to vector<32x256xbf16>
    %c0_2 = arith.constant 0 : index
    %c0_3 = arith.constant 0 : index
    %2 = vector.load %arg3[%c0_2, %c0_3] : memref<256x256xbf16, #tpu.memory_space<vmem>>, vector<256x256xbf16>
    %cst = arith.constant dense<0.000000e+00> : vector<32x256xf32>
    %3 = tpu.matmul %1, %2, %cst {dimension_numbers = #tpu.dot_dimension_numbers<[1], [0], [0], [1], [0, 0, 1, 1], [], []>} : vector<32x256xbf16>, vector<256x256xbf16>, vector<32x256xf32> -> vector<32x256xf32>
    %c0_4 = arith.constant 0 : index
    %c0_5 = arith.constant 0 : index
    %4 = vector.load %arg4[%c0_4, %c0_5] : memref<1x256xf32, #tpu.memory_space<vmem>>, vector<1x256xf32>
    %5 = vector.broadcast %4 : vector<1x256xf32> to vector<32x256xf32>
    %6 = arith.addf %3, %5 : vector<32x256xf32>
    %c0_6 = arith.constant 0 : index
    %c0_7 = arith.constant 0 : index
    %c0_8 = arith.constant 0 : index
    %7 = vector.load %arg5[%c0_6, %c0_7, %c0_8] : memref<1x32x256xf32, #tpu.memory_space<vmem>>, vector<1x32x256xf32>
    %8 = vector.shape_cast %7 : vector<1x32x256xf32> to vector<32x256xf32>
    %9 = arith.addf %6, %8 : vector<32x256xf32>
    %c0_9 = arith.constant 0 : index
    %c0_10 = arith.constant 0 : index
    %c0_11 = arith.constant 0 : index
    %10 = vector.load %arg7[%c0_9, %c0_10, %c0_11] : memref<1x32x1xf32, #tpu.memory_space<vmem>>, vector<1x32x1xf32>
    %11 = vector.shape_cast %10 : vector<1x32x1xf32> to vector<32x1xf32>
    %cst_12 = arith.constant 1.000000e+00 : f32
    %12 = vector.broadcast %cst_12 : f32 to vector<32x1xf32>
    %13 = arith.subf %12, %11 : vector<32x1xf32>
    %14 = vector.broadcast %13 : vector<32x1xf32> to vector<32x256xf32>
    %15 = arith.mulf %9, %14 : vector<32x256xf32>
    %c0_13 = arith.constant 0 : index
    %c0_14 = arith.constant 0 : index
    %16 = vector.load %arg6[%c0_13, %c0_14] : memref<1x256xf32, #tpu.memory_space<vmem>>, vector<1x256xf32>
    %17 = vector.broadcast %16 : vector<1x256xf32> to vector<32x256xf32>
    %18 = vector.broadcast %11 : vector<32x1xf32> to vector<32x256xf32>
    %19 = arith.mulf %17, %18 : vector<32x256xf32>
    %20 = arith.addf %15, %19 : vector<32x256xf32>
    %c0_15 = arith.constant 0 : index
    %c0_16 = arith.constant 0 : index
    %c0_17 = arith.constant 0 : index
    %21 = vector.load %arg8[%c0_15, %c0_16, %c0_17] : memref<1x32x256xf32, #tpu.memory_space<vmem>>, vector<1x32x256xf32>
    %22 = vector.shape_cast %21 : vector<1x32x256xf32> to vector<32x256xf32>
    %23 = vector.shape_cast %20 : vector<32x256xf32> to vector<1x32x256xf32>
    tpu.vector_store %arg8[%c0_15, %c0_16, %c0_17], %23 {strides = array<i32>} : memref<1x32x256xf32, #tpu.memory_space<vmem>>, vector<1x32x256xf32>,
    return
  }
  func.func @transform_0(%arg0: i32, %arg1: i32) -> (i32, i32, i32) {
    %c0_i32 = arith.constant 0 : i32
    %c0_i32_0 = arith.constant 0 : i32
    return %arg0, %arg1, %c0_i32 : i32, i32, i32
  }
  func.func @transform_1(%arg0: i32, %arg1: i32) -> (i32, i32) {
    %c0_i32 = arith.constant 0 : i32
    %c0_i32_0 = arith.constant 0 : i32
    %c0_i32_1 = arith.constant 0 : i32
    return %c0_i32, %c0_i32_0 : i32, i32
  }
  func.func @transform_2(%arg0: i32, %arg1: i32) -> (i32, i32) {
    %c0_i32 = arith.constant 0 : i32
    %c0_i32_0 = arith.constant 0 : i32
    %c0_i32_1 = arith.constant 0 : i32
    return %c0_i32, %c0_i32_0 : i32, i32
  }
  func.func @transform_3(%arg0: i32, %arg1: i32) -> (i32, i32, i32) {
    %c0_i32 = arith.constant 0 : i32
    %c0_i32_0 = arith.constant 0 : i32
    %c0_i32_1 = arith.constant 0 : i32
    return %c0_i32, %arg1, %c0_i32_0 : i32, i32, i32
  }
  func.func @transform_4(%arg0: i32, %arg1: i32) -> (i32, i32) {
    %c0_i32 = arith.constant 0 : i32
    %c0_i32_0 = arith.constant 0 : i32
    %c0_i32_1 = arith.constant 0 : i32
    return %c0_i32, %c0_i32_0 : i32, i32
  }
  func.func @transform_5(%arg0: i32, %arg1: i32) -> (i32, i32, i32) {
    %c0_i32 = arith.constant 0 : i32
    %c0_i32_0 = arith.constant 0 : i32
    %c0_i32_1 = arith.constant 0 : i32
    return %c0_i32, %arg1, %c0_i32_0 : i32, i32, i32
  }
  func.func @transform_6(%arg0: i32, %arg1: i32) -> (i32, i32, i32) {
    %c0_i32 = arith.constant 0 : i32
    %c0_i32_0 = arith.constant 0 : i32
    return %arg0, %arg1, %c0_i32 : i32, i32, i32
  }
}

</mosaic_0001>

<bundles_post_ra>
// kernel: tpu_custom_call.1
= control target key start
LH: loop header
LB: loop body
LE: loop exit
PB: predicated region body
PF: predicated region fallthrough
CT: control target
= control target key end

     0   :  { %s1775_s0 = inlined_call_operand.hbm [shape: bf16[2,64,256], index: 0, kind: input, shape index: {}]   ;;  %s1776_s1 = inlined_call_operand.hbm [shape: bf16[256,256], index: 1, kind: input, shape index: {}]   ;;  %s1777_s2 = inlined_call_operand.vmem [shape: f32[1,256], index: 2, kind: input, shape index: {}]   ;;  %s1778_s3 = inlined_call_operand.hbm [shape: f32[1,64,256], index: 3, kind: input, shape index: {}]   ;;  %s1779_s4 = inlined_call_operand.vmem [shape: f32[1,256], index: 4, kind: input, shape index: {}]   ;;  %s1780_s5 = inlined_call_operand.vmem [shape: f32[1,64,1], index: 5, kind: input, shape index: {}]   ;;  %s1781_s6 = inlined_call_operand.hbm [shape: f32[2,64,256], index: 6, kind: output, shape index: {}]  }
   0x1   :  { %1794 = sst [smem:[#allocation20_spill]] %s1775_s0 }
   0x2   :  { %1795 = sst [smem:[#allocation21_spill]] %s1777_s2 }
   0x3   :  { %1796 = sst [smem:[#allocation22_spill]] %s1779_s4 }
   0x4   :  { %1797 = sst [smem:[#allocation23_spill]] %s1780_s5 }
   0x5   :  { %1798 = sst [smem:[#allocation24_spill]] %s1781_s6 }
   0x6   :  { %11 = vsyncpa [#allocation3], 0 }
   0x7   :  { %13 = vsyncpa [#allocation3 + $0x1], 0 }
   0x8   :  { %14 = vsyncpa [#allocation6], 0 }
   0x9   :  { %15 = vsyncpa [#allocation4], 0 }
   0xa   :  { %17 = vsyncpa [#allocation4 + $0x1], 0  ;;  %s1444_s21 = smov 0   ;;  %s1446_s22 = smov 0  }
   0xb   :  { %s1448_s23 = smov 0   ;;  %s1450_s24 = smov 0  }
   0xc   :  { %s1452_s25 = smov 0   ;;  %s1454_s26 = smov 0  }
   0xd   :  { %s1456_s27 = smov 0   ;;  %s1458_s28 = smov 0  }
   0xe   :  { %s1460_s29 = smov 0   ;;  %s1462_s30 = smov 0  }
   0xf   :  { %s1464_s7 = smov 0  }
  0x10 LB: > { %1799 = sst [smem:[#allocation13_spill]] %s1376_s26  ;;  %s32_s8 = sadd.s32 1, %s1388_s29  ;;  %s1396_s7 = sphi %s1464_s7, %s23_s7   ;;  %s1392_s30 = sphi %s1462_s30, %s1835_s30   ;;  %s1388_s29 = sphi %s1460_s29, %s1842_s29   ;;  %s1384_s28 = sphi %s1458_s28, %s1833_s28   ;;  %s1380_s27 = sphi %s1456_s27, %s1841_s27   ;;  %s1376_s26 = sphi %s1454_s26, %s1832_s26   ;;  %s1372_s25 = sphi %s1452_s25, %s1840_s25   ;;  %s1368_s24 = sphi %s1450_s24, %s1839_s24   ;;  %s1364_s23 = sphi %s1448_s23, %s1838_s23   ;;  %s1360_s22 = sphi %s1446_s22, %s1837_s22   ;;  %s1356_s21 = sphi %s1444_s21, %s1836_s21  }
  0x11   : > { %1800 = sst [smem:[#allocation14_spill]] %s1380_s27  ;;  %s35_s9 = sadd.s32 1, %s1392_s30 }
  0x12   : > { %1801 = sst [smem:[#allocation15_spill]] %s1384_s28  ;;  %p33_p0 = scmp.ge.s32.totalorder %s32_s8, 2 }
  0x13   : > { %1802 = sst [smem:[#allocation16_spill]] %s1392_s30  ;;  %s44_s10 = sadd.s32 1, %s1376_s26 }
  0x14   : > { %p51_p1 = scmp.ne.s32.totalorder %s1376_s26, %s1372_s25  ;;  %p1786_p2 = scmp.eq.s32.totalorder %s1396_s7, 0 }
  0x15   : > { %s1844_s8 = smov (%p33_p0, %s32_s8), 0  ;;  %s1846_s9 = smov (!%p33_p0, %s35_s9), %s1392_s30 }
  0x16   : > { %1803 = sst [smem:[#allocation17_spill]] %s1844_s8  ;;  %s1510_s11 = ssub.s32 %s1388_s29, %s1844_s8 }
  0x17   : > { %p1517_p3 = por %p1786_p2, %p51_p1  ;;  %p37_p4 = scmp.ge.s32.totalorder %s1846_s9, 2 }
  0x18   : > { %p110_p5 = scmp.eq.s32.totalorder %s1510_s11, 0  ;;  %p1785_p6 = scmp.lt.s32.totalorder %s1396_s7, 4 }
  0x19   : > { %s1848_s9 = smov (%p37_p4, %s1846_s9), 0  ;;  %s243_s14 = sand.u32 1, %s1396_s7  }
  0x1a   : > { %1805 = sst [smem:[#allocation18_spill]] %s1848_s9  ;;  %s39_s13 = ssub.s32 %s1392_s30, %s1848_s9 }
  0x1b   : > { %s41_s15 = sor.u32 %s1510_s11, %s39_s13  ;;  %s245_s16 = sand.u32 1, %s1376_s26  }
  0x1c   : > { %p42_p7 = scmp.eq.s32.totalorder %s41_s15, 0  ;;  %s910_s17 = sshll.u32 %s245_s16, 5 }
  0x1d   : > { %s969_s18 = sshll.u32 %s1388_s29, 3  ;;  %s913_s20 = sshll.u32 %s1392_s30, 4 }
  0x1e   : > { %s1532_s19 = scalar_select %p42_p7, %s1376_s26, %s44_s10  }
  0x1f   : > { %s254_s8 = sadd.s32 %s969_s18, %s913_s20  ;;  %s247_s6 = scalar_lea.vmem [#allocation2], %s910_s17 }
  0x20   : > { %1806 = sst [smem:[#allocation19_spill]] %s1532_s19  ;;  %s257_s28 = sshll.u32 %s247_s6, 4  ;;  %s258_s28 = int_to_ptr.vmem [resolvable:$true] %s257_s28 }
  0x21   : > { %s914_s4 = sshll.u32 %s254_s8, 6  ;;  %s1807_s0 = sld [smem:[#allocation20_spill]] }
  0x22   : > { %p1542_p8 = pnand %p1785_p6, %p1517_p3  ;;  %s1546_s15 = scalar_lea.sflag [#allocation3], %s243_s14 }
  0x23   : > { %s1199_s10 = scalar_lea.vmem %s258_s28, 512  ;;  %s1398_s6 = smov [#allocation2]  }
  0x24   : > { %p1188_p9 = pneg %p1542_p8  ;;  %p1200_p10 = scmp.ne.s32.totalorder %s258_s28, %s1199_s10 }
  0x25   : > { %s1204_s8 = sshll.u32 %s1398_s6, 4  ;;  %s1205_s8 = int_to_ptr.vmem [resolvable:$false] %s1204_s8 }
  0x26   : > { %p1202_p11 = pnand %p1200_p10, %p1188_p9  ;;  %s1206_s2 = scalar_lea.vmem %s1205_s8, 1024 }
  0x27   : > { %s256_s27 = scalar_lea.hbm %s1807_s0, %s914_s4  ;;  %p1207_p13 = scmp.lt.s32.totalorder %s258_s28, %s1205_s8 }
  0x28   : > { %p1203_p12 = pneg %p1202_p11  ;;  %p1208_p0 = scmp.lt.s32.totalorder %s1206_s2, %s1199_s10 }
  0x2a   : > { %p1209_p4 = por %p1208_p0, %p1207_p13 }
  0x2c   : > { %p1210_p3 = pnand %p1209_p4, %p1203_p12 }
  0x2e   : > { %1213 = shalt.err (!%p1210_p3)
}
  0x2f   : > { %s1399_s4 = smov 128   ;;  %s1400_s5 = smov 8  }
  0x30   : > { %1022 = dma.hbm_to_vmem [thread:$0]  (!%p1542_p8), %s256_s27, 512, %s258_s28, %s1546_s15, %s1399_s4, %s1399_s4, %s1400_s5  }
  0x31   : > { %s1557_s12 = sadd.s32 4294967295, %s1396_s7   ;;  %s906_s14 = sadd.s32 4294967294, %s1396_s7  }
  0x32   : > { %p57_p7 = scmp.ne.s32.totalorder %s1372_s25, %s1368_s24  ;;  %p1788_p9 = scmp.eq.s32.totalorder %s1557_s12, 0 }
  0x33   : > { %p125_p10 = scmp.ne.s32.totalorder %s1360_s22, %s1356_s21  ;;  %p198_p11 = scmp.eq.s32.totalorder %s1557_s12, 3 }
  0x34   : > { %p204_p12 = scmp.eq.s32.totalorder %s906_s14, 3  ;;  %p1568_p8 = por %p1788_p9, %p57_p7 }
  0x35   : > { %p1574_p13 = por %p125_p10, %p1788_p9  ;;  %p1581_p0 = por %p198_p11, %p51_p1 }
  0x36   : > { %s1809_s27 = scalar_select %p1568_p8, 1, 0 }
  0x37   : > { %s1810_s28 = scalar_select %p1574_p13, 1, 0 }
  0x38   : > { %s1811_s21 = scalar_select %p1581_p0, 1, 0 }
  0x39   : > { %p1585_p4 = por %p204_p12, %p57_p7  ;;  %p907_p3 = scmp.ge.s32.totalorder %s1396_s7, 1 }
  0x3a   : > { %p211_p6 = scmp.lt.s32.totalorder %s1396_s7, 5  ;;  %s1401_s18 = smov [#allocation5]  }
  0x3b   : > { %s1812_s16 = scalar_select %p1585_p4, 1, 0 }
  0x3c   : > { %p1591_p2 = pnand %p907_p3, %p211_p6  ;;  %s223_s20 = sshll.u32 %s1401_s18, 4  ;;  %s224_s20 = int_to_ptr.vmem [resolvable:$true] %s223_s20 }
  0x3d   : > { %s112_s13 = sadd.s32 1, %s1364_s23  ;;  %p119_p1 = scmp.ne.s32.totalorder %s1364_s23, %s1360_s22 }
  0x3e   : > { %p1015_p10 = pneg %p1591_p2  ;;  %s269_s6 = sand.u32 1, %s1364_s23  }
  0x3f   : > { %s1610_s8 = scalar_select %p110_p5, %s1364_s23, %s112_s13  }
  0x40   : > { %p1602_p11 = pnand %p1015_p10, %p1788_p9  ;;  %p1815_p6 = scmp.eq.s32.totalorder %s1396_s7, 0 }
  0x41   : > { %s1225_s14 = scalar_lea.vmem %s224_s20, 4096  ;;  %p1233_p10 = scmp.lt.s32.totalorder %s224_s20, %s224_s20 }
  0x42   : > { %p1614_p7 = por %p119_p1, %p1815_p6  ;;  %p1216_p12 = pneg %p1602_p11 }
  0x43   : > { %p1226_p3 = scmp.ne.s32.totalorder %s224_s20, %s1225_s14  ;;  %p1234_p9 = scmp.lt.s32.totalorder %s1225_s14, %s1225_s14 }
  0x45   : > { %p1228_p4 = pnand %p1226_p3, %p1216_p12  ;;  %p1235_p13 = por %p1234_p9, %p1233_p10 }
  0x47   : > { %p1229_p0 = pneg %p1228_p4 }
  0x49   : > { %p1236_p8 = pnand %p1235_p13, %p1229_p0 }
  0x4b   : > { %1239 = shalt.err (!%p1236_p8)
}
  0x4c   : > { %1018 = dma.hbm_to_vmem [thread:$0]  (!%p1602_p11), %s1776_s1, 4096, %s224_s20, [#allocation6], %s1399_s4, %s1399_s4, %s1400_s5  }
  0x4d   : > { %s915_s13 = sshll.u32 %s269_s6, 6  ;;  %s971_s0 = sshll.u32 %s1388_s29, 10 }
  0x4e   : > { %s278_s14 = scalar_lea.hbm %s1778_s3, %s971_s0  ;;  %s271_s19 = scalar_lea.vmem [#allocation7], %s915_s13 }
  0x4f   : > { %s279_s26 = sshll.u32 %s271_s19, 4  ;;  %p1817_p5 = scmp.lt.s32.totalorder %s1396_s7, 4  ;;  %s280_s26 = int_to_ptr.vmem [resolvable:$true] %s279_s26 }
  0x50   : > { %s1253_s11 = scalar_lea.vmem %s280_s26, 1024  ;;  %s1402_s4 = smov [#allocation7]  }
  0x51   : > { %p1636_p9 = pnand %p1817_p5, %p1614_p7  ;;  %p1254_p13 = scmp.ne.s32.totalorder %s280_s26, %s1253_s11 }
  0x52   : > { %s1258_s5 = sshll.u32 %s1402_s4, 4  ;;  %s1259_s5 = int_to_ptr.vmem [resolvable:$false] %s1258_s5 }
  0x53   : > { %p1242_p8 = pneg %p1636_p9  ;;  %s1260_s0 = scalar_lea.vmem %s1259_s5, 2048 }
  0x54   : > { %p1261_p1 = scmp.lt.s32.totalorder %s280_s26, %s1259_s5  ;;  %p1262_p11 = scmp.lt.s32.totalorder %s1260_s0, %s1253_s11 }
  0x55   : > { %p1256_p0 = pnand %p1254_p13, %p1242_p8 }
  0x56   : > { %p1263_p6 = por %p1262_p11, %p1261_p1 }
  0x57   : > { %p1257_p4 = pneg %p1256_p0 }
  0x59   : > { %p1264_p12 = pnand %p1263_p6, %p1257_p4 }
  0x5b   : > { %1267 = shalt.err (!%p1264_p12)
}
  0x5c   : > { %s1403_s30 = smov 256   ;;  %s1404_s9 = smov 16  }
  0x5d   : > { %1025 = dma.hbm_to_vmem [thread:$0]  (!%p1636_p9), %s278_s14, 1024, %s280_s26, %s1546_s15, %s1403_s30, %s1403_s30, %s1404_s9  }
  0x5e   : > { %300 = sbr.rel (%p1591_p2) target bundleno = 395 (0x18b), region = 44  ;;  %s302_s19 = sand.u32 (!%p1591_p2), 1, %s1557_s12  }
  0x5f   : > { %s1649_s20 = sand.u32 (!%p1591_p2), 1, %s1372_s25   ;;  %s303_s2 = scalar_lea.sflag (!%p1591_p2), [#allocation3], %s302_s19 }
  0x60   : > { %s920_s6 = sshll.u32 (!%p1591_p2), %s1649_s20, 5  ;;  %p1819_p7 = scmp.ne.s32.totalorder (!%p1591_p2), %s1809_s27, 0 }
  0x61   : > { %s1652_s18 = scalar_lea.vmem (!%p1591_p2), [#allocation2], %s920_s6 }
  0x63   : > { %1339 = dma.done.wait (%p1819_p7), %s303_s2, 512  }
  0x64   : > { %1341 = vsyncadd (%p1819_p7), %s303_s2, 4294966784  ;;  %p1820_p3 = scmp.eq.s32.totalorder %s1557_s12, 0 }
  0x66   : > { %1343 = dma.done.wait (%p1820_p3), [#allocation6], 4096   ;;  %p1821_p2 = pmov %p1820_p3 }
  0x67   : > { %s317_s26 = sand.u32 1, %s1360_s22   ;;  %p1822_p10 = scmp.ne.s32.totalorder %s1810_s28, 0 }
  0x68   : > { %1345 = vsyncadd (%p1821_p2), [#allocation6], 4294963200  ;;  %s922_s15 = sshll.u32 %s317_s26, 6 }
  0x69   : > { %s1663_s17 = scalar_lea.vmem [#allocation7], %s922_s15 }
  0x6a   : > { %1347 = dma.done.wait (%p1822_p10), %s303_s2, 1024  }
  0x6b   : > { %1349 = vsyncadd (%p1822_p10), %s303_s2, 4294966272  ;;  %v1405_v0 = vmov 0   ;;  %s1823_s27 = sld [smem:[#allocation14_spill]]  ;;  %v1132_v1 = vld [vmem:[#allocation5 + $0x74] ss:$8 sps:$4 sm:$0xff]   ;;  %v405_v46 = vlaneseq  ;;  %v648_v61 = vld [vmem:[%s1663_s17] sm:$0xff] }
  0x6c   : > { %1131 = vset.pattern.permute.xlu1 %v1405_v0  ;;  %1130 = vset.pattern.permute.xlu0 %v1405_v0  ;;  %v1134_v2 = vld [vmem:[#allocation5 + $0x70] ss:$8 sps:$4 sm:$0xff]   ;;  %v1135_v3 = vld [vmem:[#allocation5 + $0x64] ss:$8 sps:$4 sm:$0xff]   ;;  %v1137_v4 = vld [vmem:[#allocation5 + $0x60] ss:$8 sps:$4 sm:$0xff]  }
  0x6d   : > { %595 = vmatprep.subr.bf16.mxu0 %v1132_v1  ;;  %973 = vmatprep.subr.bf16.mxu1 %v1132_v1  ;;  %v1138_v5 = vld [vmem:[#allocation5 + $0x54] ss:$8 sps:$4 sm:$0xff]   ;;  %v1140_v6 = vld [vmem:[#allocation5 + $0x50] ss:$8 sps:$4 sm:$0xff]   ;;  %v1141_v7 = vld [vmem:[#allocation5 + $0x44] ss:$8 sps:$4 sm:$0xff]  }
  0x6e   : > { %596 = vmatpush1.bf16.msra.mxu0 %v1134_v2  ;;  %989 = vmatpush1.bf16.msra.mxu1 %v1134_v2  ;;  %v1143_v8 = vld [vmem:[#allocation5 + $0x40] ss:$8 sps:$4 sm:$0xff]   ;;  %v1144_v9 = vld [vmem:[#allocation5 + $0x34] ss:$8 sps:$4 sm:$0xff]   ;;  %v1146_v10 = vld [vmem:[#allocation5 + $0x30] ss:$8 sps:$4 sm:$0xff]  }
  0x6f   : > { %597 = vmatprep.subr.bf16.mxu0 %v1135_v3  ;;  %974 = vmatprep.subr.bf16.mxu1 %v1135_v3  ;;  %v1147_v11 = vld [vmem:[#allocation5 + $0x24] ss:$8 sps:$4 sm:$0xff]   ;;  %v1149_v12 = vld [vmem:[#allocation5 + $0x20] ss:$8 sps:$4 sm:$0xff]   ;;  %v1150_v13 = vld [vmem:[#allocation5 + $0x14] ss:$8 sps:$4 sm:$0xff]  }
  0x70   : > { %s1824_s10 = sld [smem:[#allocation23_spill]]  ;;  %v1152_v14 = vld [vmem:[#allocation5 + $0x10] ss:$8 sps:$4 sm:$0xff]   ;;  %v1182_v15 = vld [vmem:[%s1652_s18 + $0x4] ss:$8 sps:$4 sm:$0xff]   ;;  %v406_v49 = vshrl.u32 %v405_v46, 7 }
  0x71   : > { %s924_s12 = sshll.u32 %s1823_s27, 2  ;;  %v1153_v16 = vld [vmem:[#allocation5 + $0x4] ss:$8 sps:$4 sm:$0xff]   ;;  %v1185_v17 = vld [vmem:[%s1652_s18 + $0x14] ss:$8 sps:$4 sm:$0xff]   ;;  %627 = vmatprep.mubr.bf16.mxu0 %v1182_v15  ;;  %s1825_s0 = sld [smem:[#allocation21_spill]] }
  0x72   : > { %598 = vmatpush1.bf16.msra.mxu0 %v1137_v4  ;;  %990 = vmatpush1.bf16.msra.mxu1 %v1137_v4  ;;  %p361_p5 = scmp.lt.s32.totalorder %s924_s12, 7  ;;  %v1155_v23 = vld [vmem:[#allocation5] ss:$8 sps:$4 sm:$0xff]   ;;  %v1156_v25 = vld [vmem:[#allocation5 + $0xf4] ss:$8 sps:$4 sm:$0xff]   ;;  %v407_v52 = vsub.s32 0, %v406_v49 }
  0x73   : > { %599 = vmatprep.subr.bf16.mxu0 %v1138_v5  ;;  %975 = vmatprep.subr.bf16.mxu1 %v1138_v5  ;;  %v1158_v28 = vld [vmem:[#allocation5 + $0xf0] ss:$8 sps:$4 sm:$0xff]   ;;  %v1159_v29 = vld [vmem:[#allocation5 + $0xe4] ss:$8 sps:$4 sm:$0xff]   ;;  %v1161_v30 = vld [vmem:[#allocation5 + $0xe0] ss:$8 sps:$4 sm:$0xff]  }
  0x74   : > { %s1850_s12 = smov (!%p361_p5, %s924_s12), 7  ;;  %637 = vmatprep.mubr.bf16.mxu1 %v1185_v17  ;;  %v1162_v31 = vld [vmem:[#allocation5 + $0xd4] ss:$8 sps:$4 sm:$0xff]   ;;  %v1164_v32 = vld [vmem:[#allocation5 + $0xd0] ss:$8 sps:$4 sm:$0xff]   ;;  %v411_v54 = vsub.s32 1, %v406_v49 }
  0x75   : > { %s925_s28 = sshll.u32 %s1850_s12, 3  ;;  %v1165_v33 = vld [vmem:[#allocation5 + $0xc4] ss:$8 sps:$4 sm:$0xff]   ;;  %v1167_v34 = vld [vmem:[#allocation5 + $0xc0] ss:$8 sps:$4 sm:$0xff]   ;;  %s1826_s19 = sld [smem:[#allocation22_spill]] }
  0x76   : > { %600 = vmatpush1.bf16.msra.mxu0 %v1140_v6  ;;  %991 = vmatpush1.bf16.msra.mxu1 %v1140_v6  ;;  %s364_s11 = scalar_lea.vmem %s1824_s10, %s925_s28  ;;  %v1168_v35 = vld [vmem:[#allocation5 + $0xb4] ss:$8 sps:$4 sm:$0xff]   ;;  %v1170_v36 = vld [vmem:[#allocation5 + $0xb0] ss:$8 sps:$4 sm:$0xff]   ;;  %v1171_v37 = vld [vmem:[#allocation5 + $0xa4] ss:$8 sps:$4 sm:$0xff]  }
  0x77   : > { %601 = vmatprep.subr.bf16.mxu0 %v1141_v7  ;;  %976 = vmatprep.subr.bf16.mxu1 %v1141_v7  ;;  %v665_v18 = vld [vmem:[%s364_s11 + $0x8] sm:$0xff]  ;;  %v664_v19 = vld [vmem:[%s364_s11] sm:$0xff]  ;;  %v666_v20 = vld [vmem:[%s364_s11 + $0x10] sm:$0xff]  ;;  %s1827_s6 = sld [smem:[#allocation15_spill]]  ;;  %s923_s2 = sshll.u32 %s1649_s20, 6 }
  0x78   : > { %719 = vperm.xlu1 %1131, %v665_v18   ;;  %714 = vperm.xlu0 %1130, %v664_v19   ;;  %v668_v21 = vsub.f32 1.0, %v664_v19  ;;  %v670_v22 = vsub.f32 1.0, %v666_v20  ;;  %v667_v24 = vld [vmem:[%s364_s11 + $0x18] sm:$0xff]  ;;  %v669_v26 = vsub.f32 1.0, %v665_v18  ;;  %v1173_v38 = vld [vmem:[#allocation5 + $0xa0] ss:$8 sps:$4 sm:$0xff]  }
  0x79   : > { %v671_v27 = vsub.f32 1.0, %v667_v24  ;;  %v1174_v39 = vld [vmem:[#allocation5 + $0x94] ss:$8 sps:$4 sm:$0xff]   ;;  %v1176_v40 = vld [vmem:[#allocation5 + $0x90] ss:$8 sps:$4 sm:$0xff]   ;;  %v652_v63 = vld [vmem:[%s1663_s17 + $0x20] sm:$0xff] }
  0x7a   : > { %602 = vmatpush1.bf16.msra.mxu0 %v1143_v8  ;;  %992 = vmatpush1.bf16.msra.mxu1 %v1143_v8  ;;  %v1177_v41 = vld [vmem:[#allocation5 + $0x84] ss:$8 sps:$4 sm:$0xff]   ;;  %v1179_v42 = vld [vmem:[#allocation5 + $0x80] ss:$8 sps:$4 sm:$0xff]   ;;  %v1183_v44 = vld [vmem:[%s1652_s18 + $0x10] ss:$8 sps:$4 sm:$0xff]  }
  0x7b   : > { %603 = vmatprep.subr.bf16.mxu0 %v1144_v9  ;;  %977 = vmatprep.subr.bf16.mxu1 %v1144_v9  ;;  %v1180_v43 = vld [vmem:[%s1652_s18] ss:$8 sps:$4 sm:$0xff]   ;;  %s972_s18 = sshll.u32 %s1823_s27, 3  ;;  %s357_s27 = scalar_lea.vmem [#allocation8], %s923_s2 }
  0x7c   : > { %684 = vperm.xlu1 %1131, %v670_v22   ;;  %674 = vperm.xlu0 %1130, %v668_v21   ;;  %v403_v51 = vld [vmem:[%s1825_s0] sm:$0x3]  ;;  %v649_v5 = vld [vmem:[%s1663_s17 + $0x8] sm:$0xff]  ;;  %v650_v21 = vld [vmem:[%s1663_s17 + $0x10] sm:$0xff]  ;;  %s773_s12 = sshll.u32 %s357_s27, 4  ;;  %s1828_s14 = sld [smem:[#allocation24_spill]]  ;;  %s1713_s12 = int_to_ptr.vmem [resolvable:$true] %s773_s12 }
  0x7d   : > { %v700_v55 = vld [vmem:[%s1826_s19] sm:$0x3]  ;;  %v408_v56 = vrot.slane %v403_v51, %v407_v52  ;;  %v412_v58 = vrot.slane %v403_v51, %v411_v54  ;;  %v653_v7 = vld [vmem:[%s1663_s17 + $0x28] sm:$0xff]  ;;  %s965_s26 = sshll.u32 %s1827_s6, 4  ;;  %v654_v22 = vld [vmem:[%s1663_s17 + $0x30] sm:$0xff]  ;;  %s757_s11 = scalar_lea.sflag [#allocation4], %s1649_s20 }
  0x7e   : > { %604 = vmatpush1.bf16.msra.mxu0 %v1146_v10  ;;  %993 = vmatpush1.bf16.msra.mxu1 %v1146_v10  ;;  %v705_v59 = vrot.slane %v700_v55, %v407_v52  ;;  %v709_v3 = vrot.slane %v700_v55, %v411_v54  ;;  %s770_s15 = sadd.s32 %s972_s18, %s965_s26  ;;  %s1268_s4 = scalar_lea.vmem %s1713_s12, 1024 }
  0x7f   : > { %605 = vmatprep.subr.bf16.mxu0 %v1147_v11  ;;  %978 = vmatprep.subr.bf16.mxu1 %v1147_v11  ;;  %p1269_p9 = scmp.ne.s32.totalorder %s1713_s12, %s1268_s4  ;;  %p1829_p8 = scmp.ne.s32.totalorder %s1811_s21, 0 }
  0x80   : > { %689 = vperm.xlu1 %1131, %v671_v27   ;;  %679 = vperm.xlu0 %1130, %v669_v26   ;;  %s1406_s5 = smov [#allocation8]  }
  0x81   : > { %p1270_p13 = pnand %p1269_p9, %p1829_p8  ;;  %s1272_s0 = sshll.u32 %s1406_s5, 4  ;;  %s1273_s0 = int_to_ptr.vmem [resolvable:$false] %s1272_s0 }
  0x82   : > { %606 = vmatpush1.bf16.msra.mxu0 %v1149_v12  ;;  %994 = vmatpush1.bf16.msra.mxu1 %v1149_v12  ;;  %s1274_s30 = scalar_lea.vmem %s1273_s0, 2048  ;;  %p1275_p4 = scmp.lt.s32.totalorder %s1713_s12, %s1273_s0 }
  0x83   : > { %607 = vmatprep.subr.bf16.mxu0 %v1150_v13  ;;  %979 = vmatprep.subr.bf16.mxu1 %v1150_v13  ;;  %p1271_p0 = pneg %p1270_p13  ;;  %p1276_p1 = scmp.lt.s32.totalorder %s1274_s30, %s1268_s4 }
  0x84   : > { %729 = vperm.xlu1 %1131, %v667_v24   ;;  %724 = vperm.xlu0 %1130, %v666_v20  }
  0x85   : > { %p1277_p11 = por %p1276_p1, %p1275_p4 }
  0x86   : > { %608 = vmatpush1.bf16.msra.mxu0 %v1152_v14  ;;  %995 = vmatpush1.bf16.msra.mxu1 %v1152_v14 }
  0x87   : > { %609 = vmatprep.subr.bf16.mxu0 %v1153_v16  ;;  %980 = vmatprep.subr.bf16.mxu1 %v1153_v16  ;;  %p1278_p6 = pnand %p1277_p11, %p1271_p0 }
  0x8a   : > { %610 = vmatpush1.bf16.msra.mxu0 %v1155_v23  ;;  %996 = vmatpush1.bf16.msra.mxu1 %v1155_v23 }
  0x8b   : > { %611 = vmatprep.subr.bf16.mxu0 %v1156_v25  ;;  %981 = vmatprep.subr.bf16.mxu1 %v1156_v25 }
  0x8e   : > { %612 = vmatpush2.bf16.msra.mxu0 %v1158_v28  ;;  %997 = vmatpush2.bf16.msra.mxu1 %v1158_v28 }
  0x8f   : > { %613 = vmatprep.subr.bf16.mxu0 %v1159_v29  ;;  %982 = vmatprep.subr.bf16.mxu1 %v1159_v29 }
  0x92   : > { %614 = vmatpush2.bf16.msra.mxu0 %v1161_v30  ;;  %998 = vmatpush2.bf16.msra.mxu1 %v1161_v30 }
  0x93   : > { %615 = vmatprep.subr.bf16.mxu0 %v1162_v31  ;;  %983 = vmatprep.subr.bf16.mxu1 %v1162_v31 }
  0x96   : > { %616 = vmatpush2.bf16.msra.mxu0 %v1164_v32  ;;  %999 = vmatpush2.bf16.msra.mxu1 %v1164_v32 }
  0x97   : > { %617 = vmatprep.subr.bf16.mxu0 %v1165_v33  ;;  %984 = vmatprep.subr.bf16.mxu1 %v1165_v33  ;;  %v651_v33 = vld [vmem:[%s1663_s17 + $0x18] sm:$0xff] }
  0x9a   : > { %618 = vmatpush2.bf16.msra.mxu0 %v1167_v34  ;;  %1000 = vmatpush2.bf16.msra.mxu1 %v1167_v34  ;;  %v655_v34 = vld [vmem:[%s1663_s17 + $0x38] sm:$0xff]  ;;  %s966_s17 = sshll.u32 %s770_s15, 7 }
  0x9b   : > { %619 = vmatprep.subr.bf16.mxu0 %v1168_v35  ;;  %985 = vmatprep.subr.bf16.mxu1 %v1168_v35  ;;  %s1711_s10 = scalar_lea.hbm %s1828_s14, %s966_s17 }
  0x9e   : > { %620 = vmatpush2.bf16.msra.mxu0 %v1170_v36  ;;  %1001 = vmatpush2.bf16.msra.mxu1 %v1170_v36 }
  0x9f   : > { %621 = vmatprep.subr.bf16.mxu0 %v1171_v37  ;;  %986 = vmatprep.subr.bf16.mxu1 %v1171_v37 }
  0xa2   : > { %622 = vmatpush2.bf16.msra.mxu0 %v1173_v38  ;;  %1002 = vmatpush2.bf16.msra.mxu1 %v1173_v38 }
  0xa3   : > { %623 = vmatprep.subr.bf16.mxu0 %v1174_v39  ;;  %987 = vmatprep.subr.bf16.mxu1 %v1174_v39 }
  0xa6   : > { %624 = vmatpush2.bf16.msra.mxu0 %v1176_v40  ;;  %1003 = vmatpush2.bf16.msra.mxu1 %v1176_v40 }
  0xa7   : > { %625 = vmatprep.subr.bf16.mxu0 %v1177_v41  ;;  %988 = vmatprep.subr.bf16.mxu1 %v1177_v41 }
  0xaa   : > { %626 = vmatpush2.bf16.msra.mxu0 %v1179_v42  ;;  %1004 = vmatpush2.bf16.msra.mxu1 %v1179_v42 }
  0xad   : > { %628 = vmatmul.mubr.bf16.vlgmr.msra.gmra.mxu0 %v1180_v43  ;;  %638 = vmatmul.mubr.bf16.vlgmr.msra.gmra.mxu1 %v1183_v44 }
  0xf3   : > { %v715_v45 = vpop.permute.xlu0 %714  ;;  %v1677_v47 = vpop.permute.xlu1 %719 }
  0xf4   : > { %v732_v12 = vmul.f32 %v715_v45, %v705_v59  ;;  %v733_v23 = vmul.f32 %v715_v45, %v709_v3  ;;  %v734_v39 = vmul.f32 %v1677_v47, %v705_v59 }
  0xf7   : > { %v675_v48 = vpop.permute.xlu0 %674  ;;  %v685_v50 = vpop.permute.xlu1 %684 }
  0xfb   : > { %v1682_v53 = vpop.permute.xlu0 %679  ;;  %v1687_v57 = vpop.permute.xlu1 %689 }
  0xff   : > { %v725_v0 = vpop.permute.xlu0 %724  ;;  %v730_v16 = vpop.permute.xlu1 %729 }
 0x100   : > { %v736_v13 = vmul.f32 %v725_v0, %v705_v59  ;;  %v737_v24 = vmul.f32 %v725_v0, %v709_v3  ;;  %v738_v40 = vmul.f32 %v730_v16, %v705_v59  ;;  %v739_v49 = vmul.f32 %v730_v16, %v709_v3 }
 0x16d   : > { %v629_v60 = vpop.f32.mrf.mxu0  ;;  %v639_v62 = vpop.f32.mrf.mxu1 }
 0x16e   : > { %v630_v1 = vadd.f32 %v629_v60, %v408_v56  ;;  %v640_v2 = vadd.f32 %v639_v62, %v408_v56 }
 0x16f   : > { %v631_v4 = vpop.f32.mrf.mxu0  ;;  %v641_v6 = vpop.f32.mrf.mxu1 }
 0x170   : > { %v656_v8 = vadd.f32 %v648_v61, %v630_v1  ;;  %v660_v9 = vadd.f32 %v652_v63, %v640_v2  ;;  %v632_v10 = vadd.f32 %v631_v4, %v412_v58  ;;  %v642_v11 = vadd.f32 %v641_v6, %v412_v58 }
 0x171   : > { %v633_v14 = vpop.f32.mrf.mxu0  ;;  %v643_v15 = vpop.f32.mrf.mxu1 }
 0x172   : > { %v692_v17 = vmul.f32 %v675_v48, %v656_v8  ;;  %v696_v18 = vmul.f32 %v685_v50, %v660_v9  ;;  %v657_v19 = vadd.f32 %v649_v5, %v632_v10  ;;  %v661_v20 = vadd.f32 %v653_v7, %v642_v11 }
 0x173   : > { %v634_v25 = vadd.f32 %v633_v14, %v408_v56  ;;  %v644_v26 = vadd.f32 %v643_v15, %v408_v56  ;;  %v635_v27 = vpop.f32.mrf.mxu0  ;;  %v645_v28 = vpop.f32.mrf.mxu1 }
 0x174   : > { %v740_v29 = vadd.f32 %v732_v12, %v692_v17  ;;  %v744_v30 = vadd.f32 %v736_v13, %v696_v18  ;;  %v693_v31 = vmul.f32 %v675_v48, %v657_v19  ;;  %v697_v32 = vmul.f32 %v685_v50, %v661_v20 }
 0x175   : > { %v658_v35 = vadd.f32 %v650_v21, %v634_v25  ;;  %v662_v36 = vadd.f32 %v654_v22, %v644_v26  ;;  %v636_v37 = vadd.f32 %v635_v27, %v412_v58  ;;  %v646_v38 = vadd.f32 %v645_v28, %v412_v58 }
 0x176   : > { %748 = vst [vmem:[%s357_s27] sm:$0xff] %v740_v29  ;;  %752 = vst [vmem:[%s357_s27 + $0x20] sm:$0xff] %v744_v30  ;;  %v741_v41 = vadd.f32 %v733_v23, %v693_v31  ;;  %v745_v42 = vadd.f32 %v737_v24, %v697_v32  ;;  %v735_v48 = vmul.f32 %v1677_v47, %v709_v3 }
 0x177   : > { %v694_v43 = vmul.f32 %v1682_v53, %v658_v35  ;;  %v698_v44 = vmul.f32 %v1687_v57, %v662_v36  ;;  %v659_v45 = vadd.f32 %v651_v33, %v636_v37  ;;  %v663_v46 = vadd.f32 %v655_v34, %v646_v38 }
 0x178   : > { %749 = vst [vmem:[%s357_s27 + $0x8] sm:$0xff] %v741_v41  ;;  %753 = vst [vmem:[%s357_s27 + $0x28] sm:$0xff] %v745_v42 }
 0x179   : > { %v742_v50 = vadd.f32 %v734_v39, %v694_v43  ;;  %v746_v51 = vadd.f32 %v738_v40, %v698_v44  ;;  %v695_v52 = vmul.f32 %v1682_v53, %v659_v45  ;;  %v699_v54 = vmul.f32 %v1687_v57, %v663_v46 }
 0x17b   : > { %750 = vst [vmem:[%s357_s27 + $0x10] sm:$0xff] %v742_v50  ;;  %754 = vst [vmem:[%s357_s27 + $0x30] sm:$0xff] %v746_v51  ;;  %v743_v47 = vadd.f32 %v735_v48, %v695_v52  ;;  %v747_v55 = vadd.f32 %v739_v49, %v699_v54 }
 0x17d   : > { %751 = vst [vmem:[%s357_s27 + $0x18] sm:$0xff] %v743_v47  ;;  %755 = vst [vmem:[%s357_s27 + $0x38] sm:$0xff] %v747_v55 }
 0x17e   : > { %1281 = shalt.err (!%p1278_p6)
}
 0x17f   : > { %s1282_s9 = scalar_lea.hbm %s1711_s10, 1024  ;;  %s1286_s2 = scalar_lea.hbm %s1828_s14, 4096 }
 0x180   : > { %p1283_p12 = scmp.ne.s32.totalorder %s1711_s10, %s1282_s9  ;;  %p1287_p2 = scmp.lt.s32.totalorder %s1711_s10, %s1828_s14 }
 0x181   : > { %p1288_p10 = scmp.lt.s32.totalorder %s1286_s2, %s1282_s9 }
 0x182   : > { %p1284_p7 = pnand %p1283_p12, %p1829_p8 }
 0x183   : > { %p1289_p5 = por %p1288_p10, %p1287_p2 }
 0x184   : > { %p1285_p3 = pneg %p1284_p7 }
 0x186   : > { %p1290_p9 = pnand %p1289_p5, %p1285_p3 }
 0x188   : > { %1293 = shalt.err (!%p1290_p9)
}
 0x189   : > { %s1407_s15 = smov 256   ;;  %s1408_s27 = smov 16  }
 0x18a   : > { %1013 = dma.vmem_to_hbm [thread:$0]  (%p1829_p8), %s1713_s12, 1024, %s1711_s10, %s757_s11, %s1407_s15, %s1407_s15, %s1408_s27  }
 0x18b PF: > { %p1033_p13 = scmp.ge.s32.totalorder %s1396_s7, 2  ;;  %s788_s17 = sand.u32 1, %s1368_s24  }
 0x18c   : > { %p1830_p0 = scmp.ne.s32.totalorder %s1812_s16, 0  ;;  %s789_s28 = scalar_lea.sflag [#allocation4], %s788_s17 }
 0x18e   : > { %p1027_p4 = pnand %p1033_p13, %p1830_p0 }
 0x190   : > { %p1028_p1 = pneg %p1027_p4 }
 0x192   : > { %1351 = dma.done.wait (%p1028_p1), %s789_s28, 1024  }
 0x193   : > { %1353 = vsyncadd (%p1028_p1), %s789_s28, 4294966272  ;;  %s23_s7 = sadd.s32 1, %s1396_s7   ;;  %s1831_s20 = sld [smem:[#allocation13_spill]] }
 0x194   : > { %p20_p11 = scmp.ge.s32.totalorder %s23_s7, 6   ;;  %s1832_s26 = sld [smem:[#allocation19_spill]] }
 0x195   : > { %s1833_s28 = sld [smem:[#allocation16_spill]]  ;;  %s1836_s21 = smov %s1360_s22 }
 0x196   : > { %s1834_s12 = sld [smem:[#allocation17_spill]]  ;;  %s1837_s22 = smov %s1364_s23 }
 0x197   : > { %s1835_s30 = sld [smem:[#allocation18_spill]]  ;;  %s1838_s23 = smov %s1610_s8 }
 0x198   : > { %s1839_s24 = smov %s1372_s25  ;;  %s1841_s27 = smov %s1388_s29 }
 0x199   : > { %s1840_s25 = smov %s1831_s20  ;;  %22 = sbr.rel (!%p20_p11) target bundleno = 16 (0x10), region = 107 }
 0x19c   : > { %s1842_s29 = smov %s1834_s12 }
 0x19e   :  { %794 = vsyncpa [#allocation3], 1 }
 0x19f   :  { %796 = vsyncpa [#allocation3 + $0x1], 1 }
 0x1a0   :  { %797 = vsyncpa [#allocation6], 1 }
 0x1a1   :  { %798 = vsyncpa [#allocation4], 1 }
 0x1a2   :  { %800 = vsyncpa [#allocation4 + $0x1], 1 }

// kernel: tpu_custom_call.1
= control target key start
LH: loop header
LB: loop body
LE: loop exit
PB: predicated region body
PF: predicated region fallthrough
CT: control target
= control target key end

     0   :  { %s1775_s0 = inlined_call_operand.hbm [shape: bf16[2,64,256], index: 0, kind: input, shape index: {}]   ;;  %s1776_s1 = inlined_call_operand.hbm [shape: bf16[256,256], index: 1, kind: input, shape index: {}]   ;;  %s1777_s2 = inlined_call_operand.vmem [shape: f32[1,256], index: 2, kind: input, shape index: {}]   ;;  %s1778_s3 = inlined_call_operand.hbm [shape: f32[1,64,256], index: 3, kind: input, shape index: {}]   ;;  %s1779_s4 = inlined_call_operand.vmem [shape: f32[1,256], index: 4, kind: input, shape index: {}]   ;;  %s1780_s5 = inlined_call_operand.vmem [shape: f32[1,64,1], index: 5, kind: input, shape index: {}]   ;;  %s1781_s6 = inlined_call_operand.hbm [shape: f32[2,64,256], index: 6, kind: output, shape index: {}]  }
   0x1   :  { %1794 = sst [smem:[#allocation20_spill]] %s1775_s0 }
   0x2   :  { %1795 = sst [smem:[#allocation21_spill]] %s1777_s2 }
   0x3   :  { %1796 = sst [smem:[#allocation22_spill]] %s1779_s4 }
   0x4   :  { %1797 = sst [smem:[#allocation23_spill]] %s1780_s5 }
   0x5   :  { %1798 = sst [smem:[#allocation24_spill]] %s1781_s6 }
   0x6   :  { %11 = vsyncpa [#allocation3], 0 }
   0x7   :  { %13 = vsyncpa [#allocation3 + $0x1], 0 }
   0x8   :  { %14 = vsyncpa [#allocation6], 0 }
   0x9   :  { %15 = vsyncpa [#allocation4], 0 }
   0xa   :  { %17 = vsyncpa [#allocation4 + $0x1], 0  ;;  %s1444_s21 = smov 0   ;;  %s1446_s22 = smov 0  }
   0xb   :  { %s1448_s23 = smov 0   ;;  %s1450_s24 = smov 0  }
   0xc   :  { %s1452_s25 = smov 0   ;;  %s1454_s26 = smov 0  }
   0xd   :  { %s1456_s27 = smov 0   ;;  %s1458_s28 = smov 0  }
   0xe   :  { %s1460_s29 = smov 0   ;;  %s1462_s30 = smov 0  }
   0xf   :  { %s1464_s7 = smov 0  }
  0x10 LB: > { %1799 = sst [smem:[#allocation13_spill]] %s1376_s26  ;;  %s32_s8 = sadd.s32 1, %s1388_s29  ;;  %s1396_s7 = sphi %s1464_s7, %s23_s7   ;;  %s1392_s30 = sphi %s1462_s30, %s1835_s30   ;;  %s1388_s29 = sphi %s1460_s29, %s1842_s29   ;;  %s1384_s28 = sphi %s1458_s28, %s1833_s28   ;;  %s1380_s27 = sphi %s1456_s27, %s1841_s27   ;;  %s1376_s26 = sphi %s1454_s26, %s1832_s26   ;;  %s1372_s25 = sphi %s1452_s25, %s1840_s25   ;;  %s1368_s24 = sphi %s1450_s24, %s1839_s24   ;;  %s1364_s23 = sphi %s1448_s23, %s1838_s23   ;;  %s1360_s22 = sphi %s1446_s22, %s1837_s22   ;;  %s1356_s21 = sphi %s1444_s21, %s1836_s21  }
  0x11   : > { %1800 = sst [smem:[#allocation14_spill]] %s1380_s27  ;;  %s35_s9 = sadd.s32 1, %s1392_s30 }
  0x12   : > { %1801 = sst [smem:[#allocation15_spill]] %s1384_s28  ;;  %p33_p0 = scmp.ge.s32.totalorder %s32_s8, 2 }
  0x13   : > { %1802 = sst [smem:[#allocation16_spill]] %s1392_s30  ;;  %s44_s10 = sadd.s32 1, %s1376_s26 }
  0x14   : > { %p51_p1 = scmp.ne.s32.totalorder %s1376_s26, %s1372_s25  ;;  %p1786_p2 = scmp.eq.s32.totalorder %s1396_s7, 0 }
  0x15   : > { %s1844_s8 = smov (%p33_p0, %s32_s8), 0  ;;  %s1846_s9 = smov (!%p33_p0, %s35_s9), %s1392_s30 }
  0x16   : > { %1803 = sst [smem:[#allocation17_spill]] %s1844_s8  ;;  %s1510_s11 = ssub.s32 %s1388_s29, %s1844_s8 }
  0x17   : > { %p1517_p3 = por %p1786_p2, %p51_p1  ;;  %p37_p4 = scmp.ge.s32.totalorder %s1846_s9, 2 }
  0x18   : > { %p110_p5 = scmp.eq.s32.totalorder %s1510_s11, 0  ;;  %p1785_p6 = scmp.lt.s32.totalorder %s1396_s7, 4 }
  0x19   : > { %s1848_s9 = smov (%p37_p4, %s1846_s9), 0  ;;  %s243_s14 = sand.u32 1, %s1396_s7  }
  0x1a   : > { %1805 = sst [smem:[#allocation18_spill]] %s1848_s9  ;;  %s39_s13 = ssub.s32 %s1392_s30, %s1848_s9 }
  0x1b   : > { %s41_s15 = sor.u32 %s1510_s11, %s39_s13  ;;  %s245_s16 = sand.u32 1, %s1376_s26  }
  0x1c   : > { %p42_p7 = scmp.eq.s32.totalorder %s41_s15, 0  ;;  %s910_s17 = sshll.u32 %s245_s16, 5 }
  0x1d   : > { %s969_s18 = sshll.u32 %s1388_s29, 3  ;;  %s913_s20 = sshll.u32 %s1392_s30, 4 }
  0x1e   : > { %s1532_s19 = scalar_select %p42_p7, %s1376_s26, %s44_s10  }
  0x1f   : > { %s254_s8 = sadd.s32 %s969_s18, %s913_s20  ;;  %s247_s6 = scalar_lea.vmem [#allocation2], %s910_s17 }
  0x20   : > { %1806 = sst [smem:[#allocation19_spill]] %s1532_s19  ;;  %s257_s28 = sshll.u32 %s247_s6, 4  ;;  %s258_s28 = int_to_ptr.vmem [resolvable:$true] %s257_s28 }
  0x21   : > { %s914_s4 = sshll.u32 %s254_s8, 6  ;;  %s1807_s0 = sld [smem:[#allocation20_spill]] }
  0x22   : > { %p1542_p8 = pnand %p1785_p6, %p1517_p3  ;;  %s1546_s15 = scalar_lea.sflag [#allocation3], %s243_s14 }
  0x23   : > { %s1199_s10 = scalar_lea.vmem %s258_s28, 512  ;;  %s1398_s6 = smov [#allocation2]  }
  0x24   : > { %p1188_p9 = pneg %p1542_p8  ;;  %p1200_p10 = scmp.ne.s32.totalorder %s258_s28, %s1199_s10 }
  0x25   : > { %s1204_s8 = sshll.u32 %s1398_s6, 4  ;;  %s1205_s8 = int_to_ptr.vmem [resolvable:$false] %s1204_s8 }
  0x26   : > { %p1202_p11 = pnand %p1200_p10, %p1188_p9  ;;  %s1206_s2 = scalar_lea.vmem %s1205_s8, 1024 }
  0x27   : > { %s256_s27 = scalar_lea.hbm %s1807_s0, %s914_s4  ;;  %p1207_p13 = scmp.lt.s32.totalorder %s258_s28, %s1205_s8 }
  0x28   : > { %p1203_p12 = pneg %p1202_p11  ;;  %p1208_p0 = scmp.lt.s32.totalorder %s1206_s2, %s1199_s10 }
  0x2a   : > { %p1209_p4 = por %p1208_p0, %p1207_p13 }
  0x2c   : > { %p1210_p3 = pnand %p1209_p4, %p1203_p12 }
  0x2e   : > { %1213 = shalt.err (!%p1210_p3)
}
  0x2f   : > { %s1399_s4 = smov 128   ;;  %s1400_s5 = smov 8  }
  0x30   : > { %1022 = dma.hbm_to_vmem [thread:$0]  (!%p1542_p8), %s256_s27, 512, %s258_s28, %s1546_s15, %s1399_s4, %s1399_s4, %s1400_s5  }
  0x31   : > { %s1557_s12 = sadd.s32 4294967295, %s1396_s7   ;;  %s906_s14 = sadd.s32 4294967294, %s1396_s7  }
  0x32   : > { %p57_p7 = scmp.ne.s32.totalorder %s1372_s25, %s1368_s24  ;;  %p1788_p9 = scmp.eq.s32.totalorder %s1557_s12, 0 }
  0x33   : > { %p125_p10 = scmp.ne.s32.totalorder %s1360_s22, %s1356_s21  ;;  %p198_p11 = scmp.eq.s32.totalorder %s1557_s12, 3 }
  0x34   : > { %p204_p12 = scmp.eq.s32.totalorder %s906_s14, 3  ;;  %p1568_p8 = por %p1788_p9, %p57_p7 }
  0x35   : > { %p1574_p13 = por %p125_p10, %p1788_p9  ;;  %p1581_p0 = por %p198_p11, %p51_p1 }
  0x36   : > { %s1809_s27 = scalar_select %p1568_p8, 1, 0 }
  0x37   : > { %s1810_s28 = scalar_select %p1574_p13, 1, 0 }
  0x38   : > { %s1811_s21 = scalar_select %p1581_p0, 1, 0 }
  0x39   : > { %p1585_p4 = por %p204_p12, %p57_p7  ;;  %p907_p3 = scmp.ge.s32.totalorder %s1396_s7, 1 }
  0x3a   : > { %p211_p6 = scmp.lt.s32.totalorder %s1396_s7, 5  ;;  %s1401_s18 = smov [#allocation5]  }
  0x3b   : > { %s1812_s16 = scalar_select %p1585_p4, 1, 0 }
  0x3c   : > { %p1591_p2 = pnand %p907_p3, %p211_p6  ;;  %s223_s20 = sshll.u32 %s1401_s18, 4  ;;  %s224_s20 = int_to_ptr.vmem [resolvable:$true] %s223_s20 }
  0x3d   : > { %s112_s13 = sadd.s32 1, %s1364_s23  ;;  %p119_p1 = scmp.ne.s32.totalorder %s1364_s23, %s1360_s22 }
  0x3e   : > { %p1015_p10 = pneg %p1591_p2  ;;  %s269_s6 = sand.u32 1, %s1364_s23  }
  0x3f   : > { %s1610_s8 = scalar_select %p110_p5, %s1364_s23, %s112_s13  }
  0x40   : > { %p1602_p11 = pnand %p1015_p10, %p1788_p9  ;;  %p1815_p6 = scmp.eq.s32.totalorder %s1396_s7, 0 }
  0x41   : > { %s1225_s14 = scalar_lea.vmem %s224_s20, 4096  ;;  %p1233_p10 = scmp.lt.s32.totalorder %s224_s20, %s224_s20 }
  0x42   : > { %p1614_p7 = por %p119_p1, %p1815_p6  ;;  %p1216_p12 = pneg %p1602_p11 }
  0x43   : > { %p1226_p3 = scmp.ne.s32.totalorder %s224_s20, %s1225_s14  ;;  %p1234_p9 = scmp.lt.s32.totalorder %s1225_s14, %s1225_s14 }
  0x45   : > { %p1228_p4 = pnand %p1226_p3, %p1216_p12  ;;  %p1235_p13 = por %p1234_p9, %p1233_p10 }
  0x47   : > { %p1229_p0 = pneg %p1228_p4 }
  0x49   : > { %p1236_p8 = pnand %p1235_p13, %p1229_p0 }
  0x4b   : > { %1239 = shalt.err (!%p1236_p8)
}
  0x4c   : > { %1018 = dma.hbm_to_vmem [thread:$0]  (!%p1602_p11), %s1776_s1, 4096, %s224_s20, [#allocation6], %s1399_s4, %s1399_s4, %s1400_s5  }
  0x4d   : > { %s915_s13 = sshll.u32 %s269_s6, 6  ;;  %s971_s0 = sshll.u32 %s1388_s29, 10 }
  0x4e   : > { %s278_s14 = scalar_lea.hbm %s1778_s3, %s971_s0  ;;  %s271_s19 = scalar_lea.vmem [#allocation7], %s915_s13 }
  0x4f   : > { %s279_s26 = sshll.u32 %s271_s19, 4  ;;  %p1817_p5 = scmp.lt.s32.totalorder %s1396_s7, 4  ;;  %s280_s26 = int_to_ptr.vmem [resolvable:$true] %s279_s26 }
  0x50   : > { %s1253_s11 = scalar_lea.vmem %s280_s26, 1024  ;;  %s1402_s4 = smov [#allocation7]  }
  0x51   : > { %p1636_p9 = pnand %p1817_p5, %p1614_p7  ;;  %p1254_p13 = scmp.ne.s32.totalorder %s280_s26, %s1253_s11 }
  0x52   : > { %s1258_s5 = sshll.u32 %s1402_s4, 4  ;;  %s1259_s5 = int_to_ptr.vmem [resolvable:$false] %s1258_s5 }
  0x53   : > { %p1242_p8 = pneg %p1636_p9  ;;  %s1260_s0 = scalar_lea.vmem %s1259_s5, 2048 }
  0x54   : > { %p1261_p1 = scmp.lt.s32.totalorder %s280_s26, %s1259_s5  ;;  %p1262_p11 = scmp.lt.s32.totalorder %s1260_s0, %s1253_s11 }
  0x55   : > { %p1256_p0 = pnand %p1254_p13, %p1242_p8 }
  0x56   : > { %p1263_p6 = por %p1262_p11, %p1261_p1 }
  0x57   : > { %p1257_p4 = pneg %p1256_p0 }
  0x59   : > { %p1264_p12 = pnand %p1263_p6, %p1257_p4 }
  0x5b   : > { %1267 = shalt.err (!%p1264_p12)
}
  0x5c   : > { %s1403_s30 = smov 256   ;;  %s1404_s9 = smov 16  }
  0x5d   : > { %1025 = dma.hbm_to_vmem [thread:$0]  (!%p1636_p9), %s278_s14, 1024, %s280_s26, %s1546_s15, %s1403_s30, %s1403_s30, %s1404_s9  }
  0x5e   : > { %300 = sbr.rel (%p1591_p2) target bundleno = 395 (0x18b), region = 44  ;;  %s302_s19 = sand.u32 (!%p1591_p2), 1, %s1557_s12  }
  0x5f   : > { %s1649_s20 = sand.u32 (!%p1591_p2), 1, %s1372_s25   ;;  %s303_s2 = scalar_lea.sflag (!%p1591_p2), [#allocation3], %s302_s19 }
  0x60   : > { %s920_s6 = sshll.u32 (!%p1591_p2), %s1649_s20, 5  ;;  %p1819_p7 = scmp.ne.s32.totalorder (!%p1591_p2), %s1809_s27, 0 }
  0x61   : > { %s1652_s18 = scalar_lea.vmem (!%p1591_p2), [#allocation2], %s920_s6 }
  0x63   : > { %1339 = dma.done.wait (%p1819_p7), %s303_s2, 512  }
  0x64   : > { %1341 = vsyncadd (%p1819_p7), %s303_s2, 4294966784  ;;  %p1820_p3 = scmp.eq.s32.totalorder %s1557_s12, 0 }
  0x66   : > { %1343 = dma.done.wait (%p1820_p3), [#allocation6], 4096   ;;  %p1821_p2 = pmov %p1820_p3 }
  0x67   : > { %s317_s26 = sand.u32 1, %s1360_s22   ;;  %p1822_p10 = scmp.ne.s32.totalorder %s1810_s28, 0 }
  0x68   : > { %1345 = vsyncadd (%p1821_p2), [#allocation6], 4294963200  ;;  %s922_s15 = sshll.u32 %s317_s26, 6 }
  0x69   : > { %s1663_s17 = scalar_lea.vmem [#allocation7], %s922_s15 }
  0x6a   : > { %1347 = dma.done.wait (%p1822_p10), %s303_s2, 1024  }
  0x6b   : > { %1349 = vsyncadd (%p1822_p10), %s303_s2, 4294966272  ;;  %v1405_v0 = vmov 0   ;;  %s1823_s27 = sld [smem:[#allocation14_spill]]  ;;  %v1132_v1 = vld [vmem:[#allocation5 + $0x74] ss:$8 sps:$4 sm:$0xff]   ;;  %v405_v46 = vlaneseq  ;;  %v648_v61 = vld [vmem:[%s1663_s17] sm:$0xff] }
  0x6c   : > { %1131 = vset.pattern.permute.xlu1 %v1405_v0  ;;  %1130 = vset.pattern.permute.xlu0 %v1405_v0  ;;  %v1134_v2 = vld [vmem:[#allocation5 + $0x70] ss:$8 sps:$4 sm:$0xff]   ;;  %v1135_v3 = vld [vmem:[#allocation5 + $0x64] ss:$8 sps:$4 sm:$0xff]   ;;  %v1137_v4 = vld [vmem:[#allocation5 + $0x60] ss:$8 sps:$4 sm:$0xff]  }
  0x6d   : > { %595 = vmatprep.subr.bf16.mxu0 %v1132_v1  ;;  %973 = vmatprep.subr.bf16.mxu1 %v1132_v1  ;;  %v1138_v5 = vld [vmem:[#allocation5 + $0x54] ss:$8 sps:$4 sm:$0xff]   ;;  %v1140_v6 = vld [vmem:[#allocation5 + $0x50] ss:$8 sps:$4 sm:$0xff]   ;;  %v1141_v7 = vld [vmem:[#allocation5 + $0x44] ss:$8 sps:$4 sm:$0xff]  }
  0x6e   : > { %596 = vmatpush1.bf16.msra.mxu0 %v1134_v2  ;;  %989 = vmatpush1.bf16.msra.mxu1 %v1134_v2  ;;  %v1143_v8 = vld [vmem:[#allocation5 + $0x40] ss:$8 sps:$4 sm:$0xff]   ;;  %v1144_v9 = vld [vmem:[#allocation5 + $0x34] ss:$8 sps:$4 sm:$0xff]   ;;  %v1146_v10 = vld [vmem:[#allocation5 + $0x30] ss:$8 sps:$4 sm:$0xff]  }
  0x6f   : > { %597 = vmatprep.subr.bf16.mxu0 %v1135_v3  ;;  %974 = vmatprep.subr.bf16.mxu1 %v1135_v3  ;;  %v1147_v11 = vld [vmem:[#allocation5 + $0x24] ss:$8 sps:$4 sm:$0xff]   ;;  %v1149_v12 = vld [vmem:[#allocation5 + $0x20] ss:$8 sps:$4 sm:$0xff]   ;;  %v1150_v13 = vld [vmem:[#allocation5 + $0x14] ss:$8 sps:$4 sm:$0xff]  }
  0x70   : > { %s1824_s10 = sld [smem:[#allocation23_spill]]  ;;  %v1152_v14 = vld [vmem:[#allocation5 + $0x10] ss:$8 sps:$4 sm:$0xff]   ;;  %v1182_v15 = vld [vmem:[%s1652_s18 + $0x4] ss:$8 sps:$4 sm:$0xff]   ;;  %v406_v49 = vshrl.u32 %v405_v46, 7 }
  0x71   : > { %s924_s12 = sshll.u32 %s1823_s27, 2  ;;  %v1153_v16 = vld [vmem:[#allocation5 + $0x4] ss:$8 sps:$4 sm:$0xff]   ;;  %v1185_v17 = vld [vmem:[%s1652_s18 + $0x14] ss:$8 sps:$4 sm:$0xff]   ;;  %627 = vmatprep.mubr.bf16.mxu0 %v1182_v15  ;;  %s1825_s0 = sld [smem:[#allocation21_spill]] }
  0x72   : > { %598 = vmatpush1.bf16.msra.mxu0 %v1137_v4  ;;  %990 = vmatpush1.bf16.msra.mxu1 %v1137_v4  ;;  %p361_p5 = scmp.lt.s32.totalorder %s924_s12, 7  ;;  %v1155_v23 = vld [vmem:[#allocation5] ss:$8 sps:$4 sm:$0xff]   ;;  %v1156_v25 = vld [vmem:[#allocation5 + $0xf4] ss:$8 sps:$4 sm:$0xff]   ;;  %v407_v52 = vsub.s32 0, %v406_v49 }
  0x73   : > { %599 = vmatprep.subr.bf16.mxu0 %v1138_v5  ;;  %975 = vmatprep.subr.bf16.mxu1 %v1138_v5  ;;  %v1158_v28 = vld [vmem:[#allocation5 + $0xf0] ss:$8 sps:$4 sm:$0xff]   ;;  %v1159_v29 = vld [vmem:[#allocation5 + $0xe4] ss:$8 sps:$4 sm:$0xff]   ;;  %v1161_v30 = vld [vmem:[#allocation5 + $0xe0] ss:$8 sps:$4 sm:$0xff]  }
  0x74   : > { %s1850_s12 = smov (!%p361_p5, %s924_s12), 7  ;;  %637 = vmatprep.mubr.bf16.mxu1 %v1185_v17  ;;  %v1162_v31 = vld [vmem:[#allocation5 + $0xd4] ss:$8 sps:$4 sm:$0xff]   ;;  %v1164_v32 = vld [vmem:[#allocation5 + $0xd0] ss:$8 sps:$4 sm:$0xff]   ;;  %v411_v54 = vsub.s32 1, %v406_v49 }
  0x75   : > { %s925_s28 = sshll.u32 %s1850_s12, 3  ;;  %v1165_v33 = vld [vmem:[#allocation5 + $0xc4] ss:$8 sps:$4 sm:$0xff]   ;;  %v1167_v34 = vld [vmem:[#allocation5 + $0xc0] ss:$8 sps:$4 sm:$0xff]   ;;  %s1826_s19 = sld [smem:[#allocation22_spill]] }
  0x76   : > { %600 = vmatpush1.bf16.msra.mxu0 %v1140_v6  ;;  %991 = vmatpush1.bf16.msra.mxu1 %v1140_v6  ;;  %s364_s11 = scalar_lea.vmem %s1824_s10, %s925_s28  ;;  %v1168_v35 = vld [vmem:[#allocation5 + $0xb4] ss:$8 sps:$4 sm:$0xff]   ;;  %v1170_v36 = vld [vmem:[#allocation5 + $0xb0] ss:$8 sps:$4 sm:$0xff]   ;;  %v1171_v37 = vld [vmem:[#allocation5 + $0xa4] ss:$8 sps:$4 sm:$0xff]  }
  0x77   : > { %601 = vmatprep.subr.bf16.mxu0 %v1141_v7  ;;  %976 = vmatprep.subr.bf16.mxu1 %v1141_v7  ;;  %v665_v18 = vld [vmem:[%s364_s11 + $0x8] sm:$0xff]  ;;  %v664_v19 = vld [vmem:[%s364_s11] sm:$0xff]  ;;  %v666_v20 = vld [vmem:[%s364_s11 + $0x10] sm:$0xff]  ;;  %s1827_s6 = sld [smem:[#allocation15_spill]]  ;;  %s923_s2 = sshll.u32 %s1649_s20, 6 }
  0x78   : > { %719 = vperm.xlu1 %1131, %v665_v18   ;;  %714 = vperm.xlu0 %1130, %v664_v19   ;;  %v668_v21 = vsub.f32 1.0, %v664_v19  ;;  %v670_v22 = vsub.f32 1.0, %v666_v20  ;;  %v667_v24 = vld [vmem:[%s364_s11 + $0x18] sm:$0xff]  ;;  %v669_v26 = vsub.f32 1.0, %v665_v18  ;;  %v1173_v38 = vld [vmem:[#allocation5 + $0xa0] ss:$8 sps:$4 sm:$0xff]  }
  0x79   : > { %v671_v27 = vsub.f32 1.0, %v667_v24  ;;  %v1174_v39 = vld [vmem:[#allocation5 + $0x94] ss:$8 sps:$4 sm:$0xff]   ;;  %v1176_v40 = vld [vmem:[#allocation5 + $0x90] ss:$8 sps:$4 sm:$0xff]   ;;  %v652_v63 = vld [vmem:[%s1663_s17 + $0x20] sm:$0xff] }
  0x7a   : > { %602 = vmatpush1.bf16.msra.mxu0 %v1143_v8  ;;  %992 = vmatpush1.bf16.msra.mxu1 %v1143_v8  ;;  %v1177_v41 = vld [vmem:[#allocation5 + $0x84] ss:$8 sps:$4 sm:$0xff]   ;;  %v1179_v42 = vld [vmem:[#allocation5 + $0x80] ss:$8 sps:$4 sm:$0xff]   ;;  %v1183_v44 = vld [vmem:[%s1652_s18 + $0x10] ss:$8 sps:$4 sm:$0xff]  }
  0x7b   : > { %603 = vmatprep.subr.bf16.mxu0 %v1144_v9  ;;  %977 = vmatprep.subr.bf16.mxu1 %v1144_v9  ;;  %v1180_v43 = vld [vmem:[%s1652_s18] ss:$8 sps:$4 sm:$0xff]   ;;  %s972_s18 = sshll.u32 %s1823_s27, 3  ;;  %s357_s27 = scalar_lea.vmem [#allocation8], %s923_s2 }
  0x7c   : > { %684 = vperm.xlu1 %1131, %v670_v22   ;;  %674 = vperm.xlu0 %1130, %v668_v21   ;;  %v403_v51 = vld [vmem:[%s1825_s0] sm:$0x3]  ;;  %v649_v5 = vld [vmem:[%s1663_s17 + $0x8] sm:$0xff]  ;;  %v650_v21 = vld [vmem:[%s1663_s17 + $0x10] sm:$0xff]  ;;  %s773_s12 = sshll.u32 %s357_s27, 4  ;;  %s1828_s14 = sld [smem:[#allocation24_spill]]  ;;  %s1713_s12 = int_to_ptr.vmem [resolvable:$true] %s773_s12 }
  0x7d   : > { %v700_v55 = vld [vmem:[%s1826_s19] sm:$0x3]  ;;  %v408_v56 = vrot.slane %v403_v51, %v407_v52  ;;  %v412_v58 = vrot.slane %v403_v51, %v411_v54  ;;  %v653_v7 = vld [vmem:[%s1663_s17 + $0x28] sm:$0xff]  ;;  %s965_s26 = sshll.u32 %s1827_s6, 4  ;;  %v654_v22 = vld [vmem:[%s1663_s17 + $0x30] sm:$0xff]  ;;  %s757_s11 = scalar_lea.sflag [#allocation4], %s1649_s20 }
  0x7e   : > { %604 = vmatpush1.bf16.msra.mxu0 %v1146_v10  ;;  %993 = vmatpush1.bf16.msra.mxu1 %v1146_v10  ;;  %v705_v59 = vrot.slane %v700_v55, %v407_v52  ;;  %v709_v3 = vrot.slane %v700_v55, %v411_v54  ;;  %s770_s15 = sadd.s32 %s972_s18, %s965_s26  ;;  %s1268_s4 = scalar_lea.vmem %s1713_s12, 1024 }
  0x7f   : > { %605 = vmatprep.subr.bf16.mxu0 %v1147_v11  ;;  %978 = vmatprep.subr.bf16.mxu1 %v1147_v11  ;;  %p1269_p9 = scmp.ne.s32.totalorder %s1713_s12, %s1268_s4  ;;  %p1829_p8 = scmp.ne.s32.totalorder %s1811_s21, 0 }
  0x80   : > { %689 = vperm.xlu1 %1131, %v671_v27   ;;  %679 = vperm.xlu0 %1130, %v669_v26   ;;  %s1406_s5 = smov [#allocation8]  }
  0x81   : > { %p1270_p13 = pnand %p1269_p9, %p1829_p8  ;;  %s1272_s0 = sshll.u32 %s1406_s5, 4  ;;  %s1273_s0 = int_to_ptr.vmem [resolvable:$false] %s1272_s0 }
  0x82   : > { %606 = vmatpush1.bf16.msra.mxu0 %v1149_v12  ;;  %994 = vmatpush1.bf16.msra.mxu1 %v1149_v12  ;;  %s1274_s30 = scalar_lea.vmem %s1273_s0, 2048  ;;  %p1275_p4 = scmp.lt.s32.totalorder %s1713_s12, %s1273_s0 }
  0x83   : > { %607 = vmatprep.subr.bf16.mxu0 %v1150_v13  ;;  %979 = vmatprep.subr.bf16.mxu1 %v1150_v13  ;;  %p1271_p0 = pneg %p1270_p13  ;;  %p1276_p1 = scmp.lt.s32.totalorder %s1274_s30, %s1268_s4 }
  0x84   : > { %729 = vperm.xlu1 %1131, %v667_v24   ;;  %724 = vperm.xlu0 %1130, %v666_v20  }
  0x85   : > { %p1277_p11 = por %p1276_p1, %p1275_p4 }
  0x86   : > { %608 = vmatpush1.bf16.msra.mxu0 %v1152_v14  ;;  %995 = vmatpush1.bf16.msra.mxu1 %v1152_v14 }
  0x87   : > { %609 = vmatprep.subr.bf16.mxu0 %v1153_v16  ;;  %980 = vmatprep.subr.bf16.mxu1 %v1153_v16  ;;  %p1278_p6 = pnand %p1277_p11, %p1271_p0 }
  0x8a   : > { %610 = vmatpush1.bf16.msra.mxu0 %v1155_v23  ;;  %996 = vmatpush1.bf16.msra.mxu1 %v1155_v23 }
  0x8b   : > { %611 = vmatprep.subr.bf16.mxu0 %v1156_v25  ;;  %981 = vmatprep.subr.bf16.mxu1 %v1156_v25 }
  0x8e   : > { %612 = vmatpush2.bf16.msra.mxu0 %v1158_v28  ;;  %997 = vmatpush2.bf16.msra.mxu1 %v1158_v28 }
  0x8f   : > { %613 = vmatprep.subr.bf16.mxu0 %v1159_v29  ;;  %982 = vmatprep.subr.bf16.mxu1 %v1159_v29 }
  0x92   : > { %614 = vmatpush2.bf16.msra.mxu0 %v1161_v30  ;;  %998 = vmatpush2.bf16.msra.mxu1 %v1161_v30 }
  0x93   : > { %615 = vmatprep.subr.bf16.mxu0 %v1162_v31  ;;  %983 = vmatprep.subr.bf16.mxu1 %v1162_v31 }
  0x96   : > { %616 = vmatpush2.bf16.msra.mxu0 %v1164_v32  ;;  %999 = vmatpush2.bf16.msra.mxu1 %v1164_v32 }
  0x97   : > { %617 = vmatprep.subr.bf16.mxu0 %v1165_v33  ;;  %984 = vmatprep.subr.bf16.mxu1 %v1165_v33  ;;  %v651_v33 = vld [vmem:[%s1663_s17 + $0x18] sm:$0xff] }
  0x9a   : > { %618 = vmatpush2.bf16.msra.mxu0 %v1167_v34  ;;  %1000 = vmatpush2.bf16.msra.mxu1 %v1167_v34  ;;  %v655_v34 = vld [vmem:[%s1663_s17 + $0x38] sm:$0xff]  ;;  %s966_s17 = sshll.u32 %s770_s15, 7 }
  0x9b   : > { %619 = vmatprep.subr.bf16.mxu0 %v1168_v35  ;;  %985 = vmatprep.subr.bf16.mxu1 %v1168_v35  ;;  %s1711_s10 = scalar_lea.hbm %s1828_s14, %s966_s17 }
  0x9e   : > { %620 = vmatpush2.bf16.msra.mxu0 %v1170_v36  ;;  %1001 = vmatpush2.bf16.msra.mxu1 %v1170_v36 }
  0x9f   : > { %621 = vmatprep.subr.bf16.mxu0 %v1171_v37  ;;  %986 = vmatprep.subr.bf16.mxu1 %v1171_v37 }
  0xa2   : > { %622 = vmatpush2.bf16.msra.mxu0 %v1173_v38  ;;  %1002 = vmatpush2.bf16.msra.mxu1 %v1173_v38 }
  0xa3   : > { %623 = vmatprep.subr.bf16.mxu0 %v1174_v39  ;;  %987 = vmatprep.subr.bf16.mxu1 %v1174_v39 }
  0xa6   : > { %624 = vmatpush2.bf16.msra.mxu0 %v1176_v40  ;;  %1003 = vmatpush2.bf16.msra.mxu1 %v1176_v40 }
  0xa7   : > { %625 = vmatprep.subr.bf16.mxu0 %v1177_v41  ;;  %988 = vmatprep.subr.bf16.mxu1 %v1177_v41 }
  0xaa   : > { %626 = vmatpush2.bf16.msra.mxu0 %v1179_v42  ;;  %1004 = vmatpush2.bf16.msra.mxu1 %v1179_v42 }
  0xad   : > { %628 = vmatmul.mubr.bf16.vlgmr.msra.gmra.mxu0 %v1180_v43  ;;  %638 = vmatmul.mubr.bf16.vlgmr.msra.gmra.mxu1 %v1183_v44 }
  0xf3   : > { %v715_v45 = vpop.permute.xlu0 %714  ;;  %v1677_v47 = vpop.permute.xlu1 %719 }
  0xf4   : > { %v732_v12 = vmul.f32 %v715_v45, %v705_v59  ;;  %v733_v23 = vmul.f32 %v715_v45, %v709_v3  ;;  %v734_v39 = vmul.f32 %v1677_v47, %v705_v59 }
  0xf7   : > { %v675_v48 = vpop.permute.xlu0 %674  ;;  %v685_v50 = vpop.permute.xlu1 %684 }
  0xfb   : > { %v1682_v53 = vpop.permute.xlu0 %679  ;;  %v1687_v57 = vpop.permute.xlu1 %689 }
  0xff   : > { %v725_v0 = vpop.permute.xlu0 %724  ;;  %v730_v16 = vpop.permute.xlu1 %729 }
 0x100   : > { %v736_v13 = vmul.f32 %v725_v0, %v705_v59  ;;  %v737_v24 = vmul.f32 %v725_v0, %v709_v3  ;;  %v738_v40 = vmul.f32 %v730_v16, %v705_v59  ;;  %v739_v49 = vmul.f32 %v730_v16, %v709_v3 }
 0x16d   : > { %v629_v60 = vpop.f32.mrf.mxu0  ;;  %v639_v62 = vpop.f32.mrf.mxu1 }
 0x16e   : > { %v630_v1 = vadd.f32 %v629_v60, %v408_v56  ;;  %v640_v2 = vadd.f32 %v639_v62, %v408_v56 }
 0x16f   : > { %v631_v4 = vpop.f32.mrf.mxu0  ;;  %v641_v6 = vpop.f32.mrf.mxu1 }
 0x170   : > { %v656_v8 = vadd.f32 %v648_v61, %v630_v1  ;;  %v660_v9 = vadd.f32 %v652_v63, %v640_v2  ;;  %v632_v10 = vadd.f32 %v631_v4, %v412_v58  ;;  %v642_v11 = vadd.f32 %v641_v6, %v412_v58 }
 0x171   : > { %v633_v14 = vpop.f32.mrf.mxu0  ;;  %v643_v15 = vpop.f32.mrf.mxu1 }
 0x172   : > { %v692_v17 = vmul.f32 %v675_v48, %v656_v8  ;;  %v696_v18 = vmul.f32 %v685_v50, %v660_v9  ;;  %v657_v19 = vadd.f32 %v649_v5, %v632_v10  ;;  %v661_v20 = vadd.f32 %v653_v7, %v642_v11 }
 0x173   : > { %v634_v25 = vadd.f32 %v633_v14, %v408_v56  ;;  %v644_v26 = vadd.f32 %v643_v15, %v408_v56  ;;  %v635_v27 = vpop.f32.mrf.mxu0  ;;  %v645_v28 = vpop.f32.mrf.mxu1 }
 0x174   : > { %v740_v29 = vadd.f32 %v732_v12, %v692_v17  ;;  %v744_v30 = vadd.f32 %v736_v13, %v696_v18  ;;  %v693_v31 = vmul.f32 %v675_v48, %v657_v19  ;;  %v697_v32 = vmul.f32 %v685_v50, %v661_v20 }
 0x175   : > { %v658_v35 = vadd.f32 %v650_v21, %v634_v25  ;;  %v662_v36 = vadd.f32 %v654_v22, %v644_v26  ;;  %v636_v37 = vadd.f32 %v635_v27, %v412_v58  ;;  %v646_v38 = vadd.f32 %v645_v28, %v412_v58 }
 0x176   : > { %748 = vst [vmem:[%s357_s27] sm:$0xff] %v740_v29  ;;  %752 = vst [vmem:[%s357_s27 + $0x20] sm:$0xff] %v744_v30  ;;  %v741_v41 = vadd.f32 %v733_v23, %v693_v31  ;;  %v745_v42 = vadd.f32 %v737_v24, %v697_v32  ;;  %v735_v48 = vmul.f32 %v1677_v47, %v709_v3 }
 0x177   : > { %v694_v43 = vmul.f32 %v1682_v53, %v658_v35  ;;  %v698_v44 = vmul.f32 %v1687_v57, %v662_v36  ;;  %v659_v45 = vadd.f32 %v651_v33, %v636_v37  ;;  %v663_v46 = vadd.f32 %v655_v34, %v646_v38 }
 0x178   : > { %749 = vst [vmem:[%s357_s27 + $0x8] sm:$0xff] %v741_v41  ;;  %753 = vst [vmem:[%s357_s27 + $0x28] sm:$0xff] %v745_v42 }
 0x179   : > { %v742_v50 = vadd.f32 %v734_v39, %v694_v43  ;;  %v746_v51 = vadd.f32 %v738_v40, %v698_v44  ;;  %v695_v52 = vmul.f32 %v1682_v53, %v659_v45  ;;  %v699_v54 = vmul.f32 %v1687_v57, %v663_v46 }
 0x17b   : > { %750 = vst [vmem:[%s357_s27 + $0x10] sm:$0xff] %v742_v50  ;;  %754 = vst [vmem:[%s357_s27 + $0x30] sm:$0xff] %v746_v51  ;;  %v743_v47 = vadd.f32 %v735_v48, %v695_v52  ;;  %v747_v55 = vadd.f32 %v739_v49, %v699_v54 }
 0x17d   : > { %751 = vst [vmem:[%s357_s27 + $0x18] sm:$0xff] %v743_v47  ;;  %755 = vst [vmem:[%s357_s27 + $0x38] sm:$0xff] %v747_v55 }
 0x17e   : > { %1281 = shalt.err (!%p1278_p6)
}
 0x17f   : > { %s1282_s9 = scalar_lea.hbm %s1711_s10, 1024  ;;  %s1286_s2 = scalar_lea.hbm %s1828_s14, 4096 }
 0x180   : > { %p1283_p12 = scmp.ne.s32.totalorder %s1711_s10, %s1282_s9  ;;  %p1287_p2 = scmp.lt.s32.totalorder %s1711_s10, %s1828_s14 }
 0x181   : > { %p1288_p10 = scmp.lt.s32.totalorder %s1286_s2, %s1282_s9 }
 0x182   : > { %p1284_p7 = pnand %p1283_p12, %p1829_p8 }
 0x183   : > { %p1289_p5 = por %p1288_p10, %p1287_p2 }
 0x184   : > { %p1285_p3 = pneg %p1284_p7 }
 0x186   : > { %p1290_p9 = pnand %p1289_p5, %p1285_p3 }
 0x188   : > { %1293 = shalt.err (!%p1290_p9)
}
 0x189   : > { %s1407_s15 = smov 256   ;;  %s1408_s27 = smov 16  }
 0x18a   : > { %1013 = dma.vmem_to_hbm [thread:$0]  (%p1829_p8), %s1713_s12, 1024, %s1711_s10, %s757_s11, %s1407_s15, %s1407_s15, %s1408_s27  }
 0x18b PF: > { %p1033_p13 = scmp.ge.s32.totalorder %s1396_s7, 2  ;;  %s788_s17 = sand.u32 1, %s1368_s24  }
 0x18c   : > { %p1830_p0 = scmp.ne.s32.totalorder %s1812_s16, 0  ;;  %s789_s28 = scalar_lea.sflag [#allocation4], %s788_s17 }
 0x18e   : > { %p1027_p4 = pnand %p1033_p13, %p1830_p0 }
 0x190   : > { %p1028_p1 = pneg %p1027_p4 }
 0x192   : > { %1351 = dma.done.wait (%p1028_p1), %s789_s28, 1024  }
 0x193   : > { %1353 = vsyncadd (%p1028_p1), %s789_s28, 4294966272  ;;  %s23_s7 = sadd.s32 1, %s1396_s7   ;;  %s1831_s20 = sld [smem:[#allocation13_spill]] }
 0x194   : > { %p20_p11 = scmp.ge.s32.totalorder %s23_s7, 6   ;;  %s1832_s26 = sld [smem:[#allocation19_spill]] }
 0x195   : > { %s1833_s28 = sld [smem:[#allocation16_spill]]  ;;  %s1836_s21 = smov %s1360_s22 }
 0x196   : > { %s1834_s12 = sld [smem:[#allocation17_spill]]  ;;  %s1837_s22 = smov %s1364_s23 }
 0x197   : > { %s1835_s30 = sld [smem:[#allocation18_spill]]  ;;  %s1838_s23 = smov %s1610_s8 }
 0x198   : > { %s1839_s24 = smov %s1372_s25  ;;  %s1841_s27 = smov %s1388_s29 }
 0x199   : > { %s1840_s25 = smov %s1831_s20  ;;  %22 = sbr.rel (!%p20_p11) target bundleno = 16 (0x10), region = 107 }
 0x19c   : > { %s1842_s29 = smov %s1834_s12 }
 0x19e   :  { %794 = vsyncpa [#allocation3], 1 }
 0x19f   :  { %796 = vsyncpa [#allocation3 + $0x1], 1 }
 0x1a0   :  { %797 = vsyncpa [#allocation6], 1 }
 0x1a1   :  { %798 = vsyncpa [#allocation4], 1 }
 0x1a2   :  { %800 = vsyncpa [#allocation4 + $0x1], 1 }

</bundles_post_ra>
